<compile_context>
chip_gen: v6e
topology: v6e:2x2x1
jax: 0.10.0
libtpu: 0.0.40
codegen_flags: <defaults>
</compile_context>

<pallas_src>
import functools

import jax
import jax.numpy as jnp
from jax.experimental import pallas as pl
from jax.experimental.pallas import tpu as pltpu


# ---------------------------------------------------------------------------
# Kernels
# ---------------------------------------------------------------------------

def _coupling_compute(mask, z, w1_ref, b1_ref, w2_ref, b2_ref,
                      wst_ref, bst_ref, c_in):
    """Shared net + fused scale/translation heads. Epilogue math stays in f32."""
    mm_dtype = w1_ref.dtype                      # bf16 matmul operands
    masked_z = mask * z                          # f32

    # shared_net: Linear(C, H) -> ReLU -> Linear(H, H) -> ReLU
    h = jnp.dot(masked_z.astype(mm_dtype), w1_ref[...],
                preferred_element_type=jnp.float32) + b1_ref[...]
    h = jnp.maximum(h, 0.0)
    h = jnp.dot(h.astype(mm_dtype), w2_ref[...],
                preferred_element_type=jnp.float32) + b2_ref[...]
    h = jnp.maximum(h, 0.0)

    # Fused heads: one (tb, H) @ (H, 2C) matmul; slice scale / translation at a
    # lane-aligned boundary (C % 128 == 0 is asserted in the wrapper).
    st = jnp.dot(h.astype(mm_dtype), wst_ref[...],
                 preferred_element_type=jnp.float32) + bst_ref[...]
    scale = jnp.tanh(st[:, :c_in])
    translation = st[:, c_in:]
    return masked_z, scale, translation


def coupling_fwd_kernel(mask_ref, z_ref, ldj_ref,
                        w1_ref, b1_ref, w2_ref, b2_ref, wst_ref, bst_ref,
                        z_out_ref, ldj_out_ref, *, c_in: int):
    mask = mask_ref[...]                         # (1, C)
    z = z_ref[...]                               # (tb, C)
    masked_z, scale, translation = _coupling_compute(
        mask, z, w1_ref, b1_ref, w2_ref, b2_ref, wst_ref, bst_ref, c_in)
    inv_mask = 1.0 - mask
    z_out_ref[...] = masked_z + inv_mask * (z * jnp.exp(scale) + translation)
    ldj_out_ref[...] = ldj_ref[...] + jnp.sum(inv_mask * scale, axis=1,
                                              keepdims=True)


def coupling_rev_kernel(mask_ref, z_ref,
                        w1_ref, b1_ref, w2_ref, b2_ref, wst_ref, bst_ref,
                        z_out_ref, *, c_in: int):
    mask = mask_ref[...]
    z = z_ref[...]
    masked_z, scale, translation = _coupling_compute(
        mask, z, w1_ref, b1_ref, w2_ref, b2_ref, wst_ref, bst_ref, c_in)
    inv_mask = 1.0 - mask
    z_out_ref[...] = masked_z + inv_mask * ((z - translation) * jnp.exp(-scale))


# ---------------------------------------------------------------------------
# Wrapper helpers
# ---------------------------------------------------------------------------

def _num_tensorcores_per_device():
    """2 TensorCores on v7x (megacore sharding via the 'parallel' grid axis);
    1 on v5e/v6e. Falls back to 1 if the device kind can't be read."""
    try:
        kind = str(getattr(jax.devices()[0], "device_kind", "")).lower()
        if "v7" in kind:
            return 2
    except Exception:
        pass
    return 1


def _pick_tb(batch, c_in, num_tc, max_tile_bytes=8 << 20):
    """Batch tile: one grid step per TensorCore (grid is a serial loop on a
    single TC, so extra steps are pure overhead), capped so the f32 z tile
    stays comfortably inside VMEM, rounded to a multiple of 8 dividing B."""
    tb = max(1, batch // num_tc)
    tb = min(tb, max(8, max_tile_bytes // (4 * c_in)))
    if batch % tb != 0 or (tb % 8 != 0 and tb != batch):
        tb = next(t for t in range(min(tb, batch), 0, -1)
                  if batch % t == 0 and (t % 8 == 0 or t == batch))
    return tb


def prepare_params(params, matmul_dtype=jnp.bfloat16):
    """One-time parameter prep (hoisted out of the per-call wrapper): fuse the
    scale/translation heads into a single (H, 2C) weight and cast matmul
    operands to bf16; biases stay f32 (added to the f32 accumulator)."""
    return {
        "w1": params["w1"].astype(matmul_dtype),
        "b1": params["b1"].astype(jnp.float32),
        "w2": params["w2"].astype(matmul_dtype),
        "b2": params["b2"].astype(jnp.float32),
        "wst": jnp.concatenate([params["ws"], params["wt"]],
                               axis=1).astype(matmul_dtype),
        "bst": jnp.concatenate([params["bs"], params["bt"]],
                               axis=1).astype(jnp.float32),
    }


def coupling_forward(z, ldj, mask, prepared, *, reverse=False, tb=None):
    """z: (B, C) f32, ldj: (B,) f32, mask: (C,) f32, prepared: prepare_params().
    Returns (z_out, ldj_out) with the same semantics as the PyTorch module."""
    B, C = z.shape
    H = prepared["w1"].shape[1]
    assert prepared["wst"].shape == (H, 2 * C)
    assert C % 128 == 0, "fused-head slicing assumes lane-aligned c_in"

    if tb is None:
        tb = _pick_tb(B, C, _num_tensorcores_per_device())

    mask2d = mask.reshape(1, C).astype(jnp.float32)

    zmap = lambda i: (i, 0)      # tile the batch
    rep = lambda i: (0, 0)       # constant block (weights / mask / biases)
    one_buf = pl.Buffered(1)     # single-buffer the constant blocks

    const_specs = [
        pl.BlockSpec((C, H), rep, pipeline_mode=one_buf),        # w1
        pl.BlockSpec((1, H), rep, pipeline_mode=one_buf),        # b1
        pl.BlockSpec((H, H), rep, pipeline_mode=one_buf),        # w2
        pl.BlockSpec((1, H), rep, pipeline_mode=one_buf),        # b2
        pl.BlockSpec((H, 2 * C), rep, pipeline_mode=one_buf),    # w_st (fused)
        pl.BlockSpec((1, 2 * C), rep, pipeline_mode=one_buf),    # b_st
    ]
    mask_spec = pl.BlockSpec((1, C), rep, pipeline_mode=one_buf)

    wbytes = jnp.dtype(prepared["w1"].dtype).itemsize
    weight_bytes = wbytes * (C * H + H * H + H * 2 * C) + 4 * (2 * H + 2 * C)
    flops = 2 * B * (C * H + H * H + H * 2 * C)
    cparams = pltpu.CompilerParams(dimension_semantics=("parallel",))

    if not reverse:
        ldj2d = ldj.reshape(B, 1).astype(jnp.float32)
        cost = pl.CostEstimate(
            flops=flops,
            transcendentals=2 * B * C,                       # tanh + exp
            bytes_accessed=8 * B * C + 8 * B + 4 * C + weight_bytes,
        )
        kernel = functools.partial(coupling_fwd_kernel, c_in=C)
        z_out, ldj_out = pl.pallas_call(
            kernel,
            out_shape=[jax.ShapeDtypeStruct((B, C), jnp.float32),
                       jax.ShapeDtypeStruct((B, 1), jnp.float32)],
            grid_spec=pltpu.PrefetchScalarGridSpec(
                num_scalar_prefetch=0,
                grid=(B // tb,),
                in_specs=[mask_spec,
                          pl.BlockSpec((tb, C), zmap),
                          pl.BlockSpec((tb, 1), zmap)] + const_specs,
                out_specs=[pl.BlockSpec((tb, C), zmap),
                           pl.BlockSpec((tb, 1), zmap)]),
            compiler_params=cparams,
            cost_estimate=cost,
        )(mask2d, z, ldj2d,
          prepared["w1"], prepared["b1"], prepared["w2"], prepared["b2"],
          prepared["wst"], prepared["bst"])
        return z_out, ldj_out.reshape(B)
    else:
        # ldj is not read in reverse mode: skip its DMA; zeros produced outside.
        cost = pl.CostEstimate(
            flops=flops,
            transcendentals=2 * B * C,                       # tanh + exp(-s)
            bytes_accessed=8 * B * C + 4 * C + weight_bytes,
        )
        kernel = functools.partial(coupling_rev_kernel, c_in=C)
        z_out = pl.pallas_call(
            kernel,
            out_shape=jax.ShapeDtypeStruct((B, C), jnp.float32),
            grid_spec=pltpu.PrefetchScalarGridSpec(
                num_scalar_prefetch=0,
                grid=(B // tb,),
                in_specs=[mask_spec,
                          pl.BlockSpec((tb, C), zmap)] + const_specs,
                out_specs=pl.BlockSpec((tb, C), zmap)),
            compiler_params=cparams,
            cost_estimate=cost,
        )(mask2d, z,
          prepared["w1"], prepared["b1"], prepared["w2"], prepared["b2"],
          prepared["wst"], prepared["bst"])
        return z_out, jnp.zeros_like(ldj)


# ---------------------------------------------------------------------------
# Pure-JAX reference (mirrors the PyTorch module; optional bf16 matmul operands)
# ---------------------------------------------------------------------------

def coupling_reference(z, ldj, mask, params, *, reverse=False,
                       matmul_dtype=jnp.float32):
    md = matmul_dtype
    masked_z = mask[None, :] * z
    h = jax.nn.relu(jnp.dot(masked_z.astype(md), params["w1"].astype(md),
                            preferred_element_type=jnp.float32) + params["b1"])
    h = jax.nn.relu(jnp.dot(h.astype(md), params["w2"].astype(md),
                            preferred_element_type=jnp.float32) + params["b2"])
    scale = jnp.tanh(jnp.dot(h.astype(md), params["ws"].astype(md),
                             preferred_element_type=jnp.float32) + params["bs"])
    translation = jnp.dot(h.astype(md), params["wt"].astype(md),
                          preferred_element_type=jnp.float32) + params["bt"]
    inv = 1.0 - mask[None, :]
    if not reverse:
        z_out = masked_z + inv * (z * jnp.exp(scale) + translation)
        ldj_out = ldj + jnp.sum(inv * scale, axis=1)
    else:
        z_out = masked_z + inv * ((z - translation) * jnp.exp(-scale))
        ldj_out = jnp.zeros_like(ldj)
    return z_out, ldj_out


def init_params(key, c_in, n_hidden):
    """Shapes per Coupling.__init__ (weights stored (in, out)); scale_net and
    translation_net are zero-initialized exactly as in the PyTorch module."""
    k1, k2, k3, k4 = jax.random.split(key, 4)
    s1 = 1.0 / jnp.sqrt(c_in)
    s2 = 1.0 / jnp.sqrt(n_hidden)
    return {
        "w1": jax.random.uniform(k1, (c_in, n_hidden), jnp.float32, -s1, s1),
        "b1": jax.random.uniform(k2, (1, n_hidden), jnp.float32, -s1, s1),
        "w2": jax.random.uniform(k3, (n_hidden, n_hidden), jnp.float32, -s2, s2),
        "b2": jax.random.uniform(k4, (1, n_hidden), jnp.float32, -s2, s2),
        "ws": jnp.zeros((n_hidden, c_in), jnp.float32),
        "bs": jnp.zeros((1, c_in), jnp.float32),
        "wt": jnp.zeros((n_hidden, c_in), jnp.float32),
        "bt": jnp.zeros((1, c_in), jnp.float32),
    }


if __name__ == "__main__":
    # batch, c_in, n_hidden. C=128 keeps the fused-head slice lane-aligned.
    B, C, H = 256, 128, 256

    key = jax.random.PRNGKey(0)
    kz, kl, kp, kh = jax.random.split(key, 4)

    z = jax.random.normal(kz, (B, C), jnp.float32)
    ldj = jax.random.normal(kl, (B,), jnp.float32)
    mask = (jnp.arange(C) % 2).astype(jnp.float32)   # checkerboard over features

    # 1) module-faithful init (zeroed heads): coupling is the identity on z / ldj.
    params0 = init_params(kp, C, H)
    prepared0 = prepare_params(params0)
    z0, l0 = coupling_forward(z, ldj, mask, prepared0, reverse=False)
    jax.block_until_ready((z0, l0))
    assert jnp.allclose(z0, z, atol=1e-6)
    assert jnp.allclose(l0, ldj, atol=1e-6)

    # 2) random heads (stand-in for a trained layer) to exercise the full math.
    params = dict(params0)
    k1, k2, k3, k4 = jax.random.split(kh, 4)
    s = 1.0 / jnp.sqrt(H)
    params["ws"] = jax.random.uniform(k1, (H, C), jnp.float32, -s, s)
    params["bs"] = jax.random.uniform(k2, (1, C), jnp.float32, -s, s)
    params["wt"] = jax.random.uniform(k3, (H, C), jnp.float32, -s, s)
    params["bt"] = jax.random.uniform(k4, (1, C), jnp.float32, -s, s)
    prepared = prepare_params(params)
    jax.block_until_ready(prepared)   # one-time prep, not per-call work

    for reverse in (False, True):
        zk, lk = coupling_forward(z, ldj, mask, prepared, reverse=reverse)
        jax.block_until_ready((zk, lk))

        # Reference with the same matmul precision as the kernel (bf16 operands,
        # f32 accumulation): should agree tightly.
        zm, lm = coupling_reference(z, ldj, mask, params, reverse=reverse,
                                    matmul_dtype=jnp.bfloat16)
        assert jnp.allclose(zk, zm, atol=1e-3, rtol=1e-3)
        assert jnp.allclose(lk, lm, atol=1e-3, rtol=1e-3)

        # Full-f32 reference: loose sanity bound on the bf16 quantization error.
        zf, lf = coupling_reference(z, ldj, mask, params, reverse=reverse)
        assert jnp.allclose(zk, zf, atol=1e-1, rtol=1e-1)
        assert jnp.allclose(lk, lf, atol=5e-1, rtol=1e-1)

    print("KERNEL_OK")
</pallas_src>

<mosaic_0001>
module attributes {stable_mosaic.version = 11 : i64} {
  func.func @coupling_fwd_kernel(%arg0: i32, %arg1: memref<1x128xf32, #tpu.memory_space<vmem>>, %arg2: memref<256x128xf32, #tpu.memory_space<vmem>>, %arg3: memref<256x1xf32, #tpu.memory_space<vmem>>, %arg4: memref<128x256xbf16, #tpu.memory_space<vmem>>, %arg5: memref<1x256xf32, #tpu.memory_space<vmem>>, %arg6: memref<256x256xbf16, #tpu.memory_space<vmem>>, %arg7: memref<1x256xf32, #tpu.memory_space<vmem>>, %arg8: memref<256x256xbf16, #tpu.memory_space<vmem>>, %arg9: memref<1x256xf32, #tpu.memory_space<vmem>>, %arg10: memref<256x128xf32, #tpu.memory_space<vmem>>, %arg11: memref<256x1xf32, #tpu.memory_space<vmem>>) attributes {dimension_semantics = [#tpu.dimension_semantics<parallel>], iteration_bounds = array<i64: 1>, scalar_prefetch = 0 : i64, scratch_operands = 0 : i64, tpu.core_type = #tpu.core_type<tc>, window_params = [{pipeline_mode = #tpu.pipeline_mode<synchronous>, transform_indices = @transform_0, window_bounds = array<i64: 1, 128>}, {transform_indices = @transform_1, window_bounds = array<i64: 256, 128>}, {transform_indices = @transform_2, window_bounds = array<i64: 256, 1>}, {pipeline_mode = #tpu.pipeline_mode<synchronous>, transform_indices = @transform_3, window_bounds = array<i64: 128, 256>}, {pipeline_mode = #tpu.pipeline_mode<synchronous>, transform_indices = @transform_4, window_bounds = array<i64: 1, 256>}, {pipeline_mode = #tpu.pipeline_mode<synchronous>, transform_indices = @transform_5, window_bounds = array<i64: 256, 256>}, {pipeline_mode = #tpu.pipeline_mode<synchronous>, transform_indices = @transform_6, window_bounds = array<i64: 1, 256>}, {pipeline_mode = #tpu.pipeline_mode<synchronous>, transform_indices = @transform_7, window_bounds = array<i64: 256, 256>}, {pipeline_mode = #tpu.pipeline_mode<synchronous>, transform_indices = @transform_8, window_bounds = array<i64: 1, 256>}, {transform_indices = @transform_9, window_bounds = array<i64: 256, 128>}, {transform_indices = @transform_10, window_bounds = array<i64: 256, 1>}]} {
    %c0 = arith.constant 0 : index
    %c0_0 = arith.constant 0 : index
    %0 = vector.load %arg1[%c0, %c0_0] : memref<1x128xf32, #tpu.memory_space<vmem>>, vector<1x128xf32>
    %c0_1 = arith.constant 0 : index
    %c0_2 = arith.constant 0 : index
    %1 = vector.load %arg2[%c0_1, %c0_2] : memref<256x128xf32, #tpu.memory_space<vmem>>, vector<256x128xf32>
    %2 = vector.broadcast %0 : vector<1x128xf32> to vector<256x128xf32>
    %3 = arith.mulf %2, %1 : vector<256x128xf32>
    %4 = arith.truncf %3 : vector<256x128xf32> to vector<256x128xbf16>
    %c0_3 = arith.constant 0 : index
    %c0_4 = arith.constant 0 : index
    %5 = vector.load %arg4[%c0_3, %c0_4] : memref<128x256xbf16, #tpu.memory_space<vmem>>, vector<128x256xbf16>
    %cst = arith.constant dense<0.000000e+00> : vector<256x256xf32>
    %6 = tpu.matmul %4, %5, %cst {dimension_numbers = #tpu.dot_dimension_numbers<[1], [0], [0], [1], [0, 0, 1, 1], [], []>} : vector<256x128xbf16>, vector<128x256xbf16>, vector<256x256xf32> -> vector<256x256xf32>
    %c0_5 = arith.constant 0 : index
    %c0_6 = arith.constant 0 : index
    %7 = vector.load %arg5[%c0_5, %c0_6] : memref<1x256xf32, #tpu.memory_space<vmem>>, vector<1x256xf32>
    %8 = vector.broadcast %7 : vector<1x256xf32> to vector<256x256xf32>
    %9 = arith.addf %6, %8 : vector<256x256xf32>
    %cst_7 = arith.constant 0.000000e+00 : f32
    %10 = vector.broadcast %cst_7 : f32 to vector<256x256xf32>
    %11 = arith.maximumf %9, %10 : vector<256x256xf32>
    %12 = arith.truncf %11 : vector<256x256xf32> to vector<256x256xbf16>
    %c0_8 = arith.constant 0 : index
    %c0_9 = arith.constant 0 : index
    %13 = vector.load %arg6[%c0_8, %c0_9] : memref<256x256xbf16, #tpu.memory_space<vmem>>, vector<256x256xbf16>
    %cst_10 = arith.constant dense<0.000000e+00> : vector<256x256xf32>
    %14 = tpu.matmul %12, %13, %cst_10 {dimension_numbers = #tpu.dot_dimension_numbers<[1], [0], [0], [1], [0, 0, 1, 1], [], []>} : vector<256x256xbf16>, vector<256x256xbf16>, vector<256x256xf32> -> vector<256x256xf32>
    %c0_11 = arith.constant 0 : index
    %c0_12 = arith.constant 0 : index
    %15 = vector.load %arg7[%c0_11, %c0_12] : memref<1x256xf32, #tpu.memory_space<vmem>>, vector<1x256xf32>
    %16 = vector.broadcast %15 : vector<1x256xf32> to vector<256x256xf32>
    %17 = arith.addf %14, %16 : vector<256x256xf32>
    %cst_13 = arith.constant 0.000000e+00 : f32
    %18 = vector.broadcast %cst_13 : f32 to vector<256x256xf32>
    %19 = arith.maximumf %17, %18 : vector<256x256xf32>
    %20 = arith.truncf %19 : vector<256x256xf32> to vector<256x256xbf16>
    %c0_14 = arith.constant 0 : index
    %c0_15 = arith.constant 0 : index
    %21 = vector.load %arg8[%c0_14, %c0_15] : memref<256x256xbf16, #tpu.memory_space<vmem>>, vector<256x256xbf16>
    %cst_16 = arith.constant dense<0.000000e+00> : vector<256x256xf32>
    %22 = tpu.matmul %20, %21, %cst_16 {dimension_numbers = #tpu.dot_dimension_numbers<[1], [0], [0], [1], [0, 0, 1, 1], [], []>} : vector<256x256xbf16>, vector<256x256xbf16>, vector<256x256xf32> -> vector<256x256xf32>
    %c0_17 = arith.constant 0 : index
    %c0_18 = arith.constant 0 : index
    %23 = vector.load %arg9[%c0_17, %c0_18] : memref<1x256xf32, #tpu.memory_space<vmem>>, vector<1x256xf32>
    %24 = vector.broadcast %23 : vector<1x256xf32> to vector<256x256xf32>
    %25 = arith.addf %22, %24 : vector<256x256xf32>
    %26 = vector.extract_strided_slice %25 {offsets = [0, 0], sizes = [256, 128], strides = [1, 1]} : vector<256x256xf32> to vector<256x128xf32>
    %27 = math.tanh %26 : vector<256x128xf32>
    %28 = vector.extract_strided_slice %25 {offsets = [0, 128], sizes = [256, 128], strides = [1, 1]} : vector<256x256xf32> to vector<256x128xf32>
    %cst_19 = arith.constant 1.000000e+00 : f32
    %29 = vector.broadcast %cst_19 : f32 to vector<1x128xf32>
    %30 = arith.subf %29, %0 : vector<1x128xf32>
    %31 = math.exp %27 : vector<256x128xf32>
    %32 = arith.mulf %1, %31 : vector<256x128xf32>
    %33 = arith.addf %32, %28 : vector<256x128xf32>
    %34 = vector.broadcast %30 : vector<1x128xf32> to vector<256x128xf32>
    %35 = arith.mulf %34, %33 : vector<256x128xf32>
    %36 = arith.addf %3, %35 : vector<256x128xf32>
    %c0_20 = arith.constant 0 : index
    %c0_21 = arith.constant 0 : index
    %37 = vector.load %arg10[%c0_20, %c0_21] : memref<256x128xf32, #tpu.memory_space<vmem>>, vector<256x128xf32>
    tpu.vector_store %arg10[%c0_20, %c0_21], %36 {strides = array<i32>} : memref<256x128xf32, #tpu.memory_space<vmem>>, vector<256x128xf32>,
    %c0_22 = arith.constant 0 : index
    %c0_23 = arith.constant 0 : index
    %38 = vector.load %arg3[%c0_22, %c0_23] : memref<256x1xf32, #tpu.memory_space<vmem>>, vector<256x1xf32>
    %39 = vector.broadcast %30 : vector<1x128xf32> to vector<256x128xf32>
    %40 = arith.mulf %39, %27 : vector<256x128xf32>
    %cst_24 = arith.constant dense<0.000000e+00> : vector<256xf32>
    %41 = vector.multi_reduction <add>, %40, %cst_24 [1] : vector<256x128xf32> to vector<256xf32>
    %42 = vector.shape_cast %41 : vector<256xf32> to vector<256x1xf32>
    %43 = arith.addf %38, %42 : vector<256x1xf32>
    %c0_25 = arith.constant 0 : index
    %c0_26 = arith.constant 0 : index
    %44 = vector.load %arg11[%c0_25, %c0_26] : memref<256x1xf32, #tpu.memory_space<vmem>>, vector<256x1xf32>
    tpu.vector_store %arg11[%c0_25, %c0_26], %43 {strides = array<i32>} : memref<256x1xf32, #tpu.memory_space<vmem>>, vector<256x1xf32>,
    return
  }
  func.func @transform_0(%arg0: i32) -> (i32, i32) {
    %c0_i32 = arith.constant 0 : i32
    %c0_i32_0 = arith.constant 0 : i32
    %c0_i32_1 = arith.constant 0 : i32
    return %c0_i32, %c0_i32_0 : i32, i32
  }
  func.func @transform_1(%arg0: i32) -> (i32, i32) {
    %c0_i32 = arith.constant 0 : i32
    %c0_i32_0 = arith.constant 0 : i32
    return %arg0, %c0_i32 : i32, i32
  }
  func.func @transform_2(%arg0: i32) -> (i32, i32) {
    %c0_i32 = arith.constant 0 : i32
    %c0_i32_0 = arith.constant 0 : i32
    return %arg0, %c0_i32 : i32, i32
  }
  func.func @transform_3(%arg0: i32) -> (i32, i32) {
    %c0_i32 = arith.constant 0 : i32
    %c0_i32_0 = arith.constant 0 : i32
    %c0_i32_1 = arith.constant 0 : i32
    return %c0_i32, %c0_i32_0 : i32, i32
  }
  func.func @transform_4(%arg0: i32) -> (i32, i32) {
    %c0_i32 = arith.constant 0 : i32
    %c0_i32_0 = arith.constant 0 : i32
    %c0_i32_1 = arith.constant 0 : i32
    return %c0_i32, %c0_i32_0 : i32, i32
  }
  func.func @transform_5(%arg0: i32) -> (i32, i32) {
    %c0_i32 = arith.constant 0 : i32
    %c0_i32_0 = arith.constant 0 : i32
    %c0_i32_1 = arith.constant 0 : i32
    return %c0_i32, %c0_i32_0 : i32, i32
  }
  func.func @transform_6(%arg0: i32) -> (i32, i32) {
    %c0_i32 = arith.constant 0 : i32
    %c0_i32_0 = arith.constant 0 : i32
    %c0_i32_1 = arith.constant 0 : i32
    return %c0_i32, %c0_i32_0 : i32, i32
  }
  func.func @transform_7(%arg0: i32) -> (i32, i32) {
    %c0_i32 = arith.constant 0 : i32
    %c0_i32_0 = arith.constant 0 : i32
    %c0_i32_1 = arith.constant 0 : i32
    return %c0_i32, %c0_i32_0 : i32, i32
  }
  func.func @transform_8(%arg0: i32) -> (i32, i32) {
    %c0_i32 = arith.constant 0 : i32
    %c0_i32_0 = arith.constant 0 : i32
    %c0_i32_1 = arith.constant 0 : i32
    return %c0_i32, %c0_i32_0 : i32, i32
  }
  func.func @transform_9(%arg0: i32) -> (i32, i32) {
    %c0_i32 = arith.constant 0 : i32
    %c0_i32_0 = arith.constant 0 : i32
    return %arg0, %c0_i32 : i32, i32
  }
  func.func @transform_10(%arg0: i32) -> (i32, i32) {
    %c0_i32 = arith.constant 0 : i32
    %c0_i32_0 = arith.constant 0 : i32
    return %arg0, %c0_i32 : i32, i32
  }
}

</mosaic_0001>

<bundles_post_ra>
// kernel: tpu_custom_call.1
= control target key start
LH: loop header
LB: loop body
LE: loop exit
PB: predicated region body
PF: predicated region fallthrough
CT: control target
= control target key end

     0   :  { %16 = vsyncpa [#allocation3], 0  ;;  %s3533_s0 = inlined_call_operand.vmem [shape: f32[1,128], index: 0, kind: input, shape index: {}]   ;;  %s3534_s1 = inlined_call_operand.vmem [shape: f32[256,128], index: 1, kind: input, shape index: {}]   ;;  %s3535_s2 = inlined_call_operand.vmem [shape: f32[256,1], index: 2, kind: input, shape index: {}]   ;;  %s3536_s3 = inlined_call_operand.hbm [shape: bf16[128,256], index: 3, kind: input, shape index: {}]   ;;  %s3537_s4 = inlined_call_operand.vmem [shape: f32[1,256], index: 4, kind: input, shape index: {}]   ;;  %s3538_s5 = inlined_call_operand.hbm [shape: bf16[256,256], index: 5, kind: input, shape index: {}]   ;;  %s3539_s6 = inlined_call_operand.vmem [shape: f32[1,256], index: 6, kind: input, shape index: {}]   ;;  %s3540_s7 = inlined_call_operand.hbm [shape: bf16[256,256], index: 7, kind: input, shape index: {}]   ;;  %s3541_s8 = inlined_call_operand.vmem [shape: f32[1,256], index: 8, kind: input, shape index: {}]   ;;  %s3542_s9 = inlined_call_operand.hbm [shape: f32[256,128], index: 9, kind: output, shape index: {0}]   ;;  %s3543_s10 = inlined_call_operand.vmem [shape: f32[256,1], index: 10, kind: output, shape index: {1}]  }
   0x1   :  { %17 = vsyncpa [#allocation6], 0 }
   0x2   :  { %18 = vsyncpa [#allocation4], 0  ;;  %s2400_s13 = smov [#allocation5]   ;;  %s2401_s15 = smov [#allocation2]  }
   0x3   :  { %s44_s14 = sshll.u32 %s2400_s13, 4  ;;  %s30_s16 = sshll.u32 %s2401_s15, 4  ;;  %s45_s14 = int_to_ptr.vmem [resolvable:$true] %s44_s14  ;;  %s31_s16 = int_to_ptr.vmem [resolvable:$true] %s30_s16 }
   0x4   :  { %s2322_s17 = scalar_lea.vmem %s45_s14, 4096  ;;  %p2327_p1 = scmp.lt.s32.totalorder %s45_s14, %s45_s14 }
   0x5   :  { %p2323_p0 = scmp.ne.s32.totalorder %s45_s14, %s2322_s17  ;;  %p2328_p2 = scmp.lt.s32.totalorder %s2322_s17, %s2322_s17 }
   0x7   :  { %p2329_p3 = por %p2328_p2, %p2327_p1 }
   0x9   :  { %p2330_p4 = pnand %p2329_p3, %p2323_p0 }
   0xb   :  { %2333 = shalt.err (!%p2330_p4)
}
   0xc   :  { %s2402_s18 = smov 128   ;;  %s2403_s19 = smov 8  }
   0xd   :  { %50 = dma.hbm_to_vmem [thread:$0]  %s3538_s5, 4096, %s45_s14, [#allocation6], %s2402_s18, %s2402_s18, %s2403_s19  }
   0xe   :  { %s2342_s22 = scalar_lea.vmem %s31_s16, 2048  ;;  %p2347_p6 = scmp.lt.s32.totalorder %s31_s16, %s31_s16 }
   0xf   :  { %p2343_p5 = scmp.ne.s32.totalorder %s31_s16, %s2342_s22  ;;  %p2348_p7 = scmp.lt.s32.totalorder %s2342_s22, %s2342_s22 }
  0x11   :  { %p2349_p8 = por %p2348_p7, %p2347_p6 }
  0x13   :  { %p2350_p9 = pnand %p2349_p8, %p2343_p5 }
  0x15   :  { %2353 = shalt.err (!%p2350_p9)
}
  0x16   :  { %36 = dma.hbm_to_vmem [thread:$0]  %s3536_s3, 2048, %s31_s16, [#allocation3], %s2402_s18, %s2402_s18, %s2403_s19  }
  0x17   :  { %s2404_s25 = smov [#allocation7]  }
  0x18   :  { %s58_s26 = sshll.u32 %s2404_s25, 4  ;;  %s59_s26 = int_to_ptr.vmem [resolvable:$true] %s58_s26 }
  0x19   :  { %s2362_s27 = scalar_lea.vmem %s59_s26, 4096  ;;  %p2367_p11 = scmp.lt.s32.totalorder %s59_s26, %s59_s26 }
  0x1a   :  { %p2363_p10 = scmp.ne.s32.totalorder %s59_s26, %s2362_s27  ;;  %p2368_p12 = scmp.lt.s32.totalorder %s2362_s27, %s2362_s27 }
  0x1c   :  { %p2369_p13 = por %p2368_p12, %p2367_p11 }
  0x1e   :  { %p2370_p0 = pnand %p2369_p13, %p2363_p10 }
  0x20   :  { %2373 = shalt.err (!%p2370_p0)
}
  0x21   :  { %64 = dma.hbm_to_vmem [thread:$0]  %s3540_s7, 4096, %s59_s26, [#allocation6], %s2402_s18, %s2402_s18, %s2403_s19  }
  0x22   :  { %2394 = dma.done.wait [#allocation3], 2048  }
  0x23   :  { %2395 = vsyncadd [#allocation3], 4294965248 }
  0x24   :  { %2396 = dma.done.wait [#allocation6], 8192  }
  0x25   :  { %2397 = vsyncadd [#allocation6], 4294959104  ;;  %v2405_v0 = vmov 0   ;;  %v2032_v1 = vld [vmem:[#allocation2 + $0x74] ss:$8 sps:$4 sm:$0xff]   ;;  %v111_v8 = vlaneseq  ;;  %v78_v20 = vld [vmem:[%s3534_s1] sm:$0xff] }
  0x26   :  { %304 = vmatprep.mubr.bf16.mxu0 %v2405_v0  ;;  %384 = vmatprep.mubr.bf16.mxu1 %v2405_v0  ;;  %v2034_v2 = vld [vmem:[#allocation2 + $0x70] ss:$8 sps:$4 sm:$0xff]   ;;  %v2035_v3 = vld [vmem:[#allocation2 + $0x64] ss:$8 sps:$4 sm:$0xff]   ;;  %v2037_v4 = vld [vmem:[#allocation2 + $0x60] ss:$8 sps:$4 sm:$0xff]  }
  0x27   :  { %272 = vmatprep.subr.bf16.mxu0 %v2032_v1  ;;  %2009 = vmatprep.subr.bf16.mxu1 %v2032_v1  ;;  %v2038_v5 = vld [vmem:[#allocation2 + $0x54] ss:$8 sps:$4 sm:$0xff]   ;;  %v2040_v6 = vld [vmem:[#allocation2 + $0x50] ss:$8 sps:$4 sm:$0xff]   ;;  %v2041_v7 = vld [vmem:[#allocation2 + $0x44] ss:$8 sps:$4 sm:$0xff]  }
  0x28   :  { %273 = vmatpush1.bf16.msra.mxu0 %v2034_v2  ;;  %2017 = vmatpush1.bf16.msra.mxu1 %v2034_v2  ;;  %v2043_v9 = vld [vmem:[#allocation2 + $0x40] ss:$8 sps:$4 sm:$0xff]   ;;  %v2044_v10 = vld [vmem:[#allocation2 + $0x34] ss:$8 sps:$4 sm:$0xff]   ;;  %v2482_v11 = vshrl.u32 %v111_v8, 7  ;;  %vm1874_vm0 = vcmask 7168  }
  0x29   :  { %274 = vmatprep.subr.bf16.mxu0 %v2035_v3  ;;  %2010 = vmatprep.subr.bf16.mxu1 %v2035_v3  ;;  %v2046_v12 = vld [vmem:[#allocation2 + $0x30] ss:$8 sps:$4 sm:$0xff]   ;;  %v2047_v13 = vld [vmem:[#allocation2 + $0x24] ss:$8 sps:$4 sm:$0xff]   ;;  %v2049_v15 = vld [vmem:[#allocation2 + $0x20] ss:$8 sps:$4 sm:$0xff]  }
  0x2a   :  { %v2485_v14 = vsub.s32 0, %v2482_v11  ;;  %v2490_v16 = vld [vmem:[%s3533_s0] ss:$0 sm:$0xff]  ;;  %v2050_v17 = vld [vmem:[#allocation2 + $0x14] ss:$8 sps:$4 sm:$0xff]   ;;  %v79_v21 = vld [vmem:[%s3534_s1 + $0x8] sm:$0xff] }
  0x2b   :  { %v2052_v18 = vld [vmem:[#allocation2 + $0x10] ss:$8 sps:$4 sm:$0xff]   ;;  %v2053_v19 = vld [vmem:[#allocation2 + $0x4] ss:$8 sps:$4 sm:$0xff]   ;;  %v2505_v24 = vmul.f32 %v2490_v16, %v78_v20  ;;  %v2508_v25 = vmul.f32 %v2490_v16, %v79_v21  ;;  %v2055_v26 = vld [vmem:[#allocation2] ss:$8 sps:$4 sm:$0xff]  }
  0x2c   :  { %275 = vmatpush1.bf16.msra.mxu0 %v2037_v4  ;;  %2018 = vmatpush1.bf16.msra.mxu1 %v2037_v4  ;;  %v94_v22 = vld [vmem:[%s3534_s1 + $0x80] sm:$0xff]  ;;  %v95_v23 = vld [vmem:[%s3534_s1 + $0x88] sm:$0xff]  ;;  %v80_v29 = vld [vmem:[%s3534_s1 + $0x10] sm:$0xff]  ;;  %s2406_s12 = smov [#allocation8]  }
  0x2d   :  { %276 = vmatprep.subr.bf16.mxu0 %v2038_v5  ;;  %2011 = vmatprep.subr.bf16.mxu1 %v2038_v5  ;;  %v2511_v27 = vmul.f32 %v2490_v16, %v94_v22  ;;  %v2514_v28 = vmul.f32 %v2490_v16, %v95_v23  ;;  %v2058_v30 = vld [vmem:[#allocation5 + $0x74] ss:$8 sps:$4 sm:$0xff]   ;;  %v148_v31 = vpack.c.bf16 %v2508_v25, %v2505_v24  ;;  %v2056_v36 = vld [vmem:[#allocation5 + $0x70] ss:$8 sps:$4 sm:$0xff]   ;;  %v2061_v37 = vld [vmem:[#allocation5 + $0x64] ss:$8 sps:$4 sm:$0xff]  }
  0x2e   :  { %v81_v32 = vld [vmem:[%s3534_s1 + $0x18] sm:$0xff]  ;;  %v96_v33 = vld [vmem:[%s3534_s1 + $0x90] sm:$0xff]  ;;  %v2533_v38 = vmul.f32 %v2490_v16, %v80_v29  ;;  %v2059_v42 = vld [vmem:[#allocation5 + $0x60] ss:$8 sps:$4 sm:$0xff]  }
  0x2f   :  { %v156_v34 = vpack.c.bf16 %v2514_v28, %v2511_v27  ;;  %v97_v35 = vld [vmem:[%s3534_s1 + $0x98] sm:$0xff]  ;;  %v2536_v39 = vmul.f32 %v2490_v16, %v81_v32  ;;  %v2540_v40 = vmul.f32 %v2490_v16, %v96_v33  ;;  %v82_v43 = vld [vmem:[%s3534_s1 + $0x20] sm:$0xff]  ;;  %v83_v44 = vld [vmem:[%s3534_s1 + $0x28] sm:$0xff] }
  0x30   :  { %277 = vmatpush1.bf16.msra.mxu0 %v2040_v6  ;;  %2019 = vmatpush1.bf16.msra.mxu1 %v2040_v6  ;;  %v2543_v41 = vmul.f32 %v2490_v16, %v97_v35  ;;  %v2064_v45 = vld [vmem:[#allocation5 + $0x54] ss:$8 sps:$4 sm:$0xff]   ;;  %v98_v47 = vld [vmem:[%s3534_s1 + $0xa0] sm:$0xff]  ;;  %v99_v48 = vld [vmem:[%s3534_s1 + $0xa8] sm:$0xff]  ;;  %v2563_v52 = vmul.f32 %v2490_v16, %v82_v43  ;;  %v2566_v53 = vmul.f32 %v2490_v16, %v83_v44 }
  0x31   :  { %278 = vmatprep.subr.bf16.mxu0 %v2041_v7  ;;  %2012 = vmatprep.subr.bf16.mxu1 %v2041_v7  ;;  %v149_v46 = vpack.c.bf16 %v2536_v39, %v2533_v38  ;;  %v2062_v49 = vld [vmem:[#allocation5 + $0x50] ss:$8 sps:$4 sm:$0xff]   ;;  %v2067_v51 = vld [vmem:[#allocation5 + $0x44] ss:$8 sps:$4 sm:$0xff]   ;;  %v2065_v54 = vld [vmem:[#allocation5 + $0x40] ss:$8 sps:$4 sm:$0xff]   ;;  %v2570_v55 = vmul.f32 %v2490_v16, %v98_v47  ;;  %v2573_v56 = vmul.f32 %v2490_v16, %v99_v48 }
  0x32   :  { %v157_v50 = vpack.c.bf16 %v2543_v41, %v2540_v40  ;;  %v2070_v57 = vld [vmem:[#allocation5 + $0x34] ss:$8 sps:$4 sm:$0xff]   ;;  %v150_v60 = vpack.c.bf16 %v2566_v53, %v2563_v52  ;;  %v2068_v63 = vld [vmem:[#allocation5 + $0x30] ss:$8 sps:$4 sm:$0xff]   ;;  %v2073_v2 = vld [vmem:[#allocation5 + $0x24] ss:$8 sps:$4 sm:$0xff]  }
  0x33   :  { %v84_v58 = vld [vmem:[%s3534_s1 + $0x30] sm:$0xff]  ;;  %v85_v59 = vld [vmem:[%s3534_s1 + $0x38] sm:$0xff]  ;;  %v158_v1 = vpack.c.bf16 %v2573_v56, %v2570_v55  ;;  %v2071_v7 = vld [vmem:[#allocation5 + $0x20] ss:$8 sps:$4 sm:$0xff]  }
  0x34   :  { %279 = vmatpush1.bf16.msra.mxu0 %v2043_v9  ;;  %2020 = vmatpush1.bf16.msra.mxu1 %v2043_v9  ;;  %v100_v61 = vld [vmem:[%s3534_s1 + $0xb0] sm:$0xff]  ;;  %v101_v62 = vld [vmem:[%s3534_s1 + $0xb8] sm:$0xff]  ;;  %v2593_v3 = vmul.f32 %v2490_v16, %v84_v58  ;;  %v2596_v4 = vmul.f32 %v2490_v16, %v85_v59  ;;  %v2091_v59 = vld [vmem:[#allocation5 + $0xc4] ss:$8 sps:$4 sm:$0xff]  }
  0x35   :  { %280 = vmatprep.subr.bf16.mxu0 %v2044_v10  ;;  %2013 = vmatprep.subr.bf16.mxu1 %v2044_v10  ;;  %v2600_v5 = vmul.f32 %v2490_v16, %v100_v61  ;;  %v2603_v6 = vmul.f32 %v2490_v16, %v101_v62  ;;  %v2076_v8 = vld [vmem:[#allocation5 + $0x14] ss:$8 sps:$4 sm:$0xff]   ;;  %v86_v10 = vld [vmem:[%s3534_s1 + $0x40] sm:$0xff]  ;;  %v2086_v58 = vld [vmem:[#allocation5 + $0xd0] ss:$8 sps:$4 sm:$0xff]  }
  0x36   :  { %v151_v9 = vpack.c.bf16 %v2596_v4, %v2593_v3  ;;  %v2623_v20 = vmul.f32 %v2490_v16, %v86_v10  ;;  %v2082_v29 = vld [vmem:[#allocation5 + $0xf4] ss:$8 sps:$4 sm:$0xff]  }
  0x37   :  { %3554 = vst [vmem:[#allocation12_spill] sm:$0xff] %v2600_v5  ;;  %3555 = vst [vmem:[#allocation13_spill] sm:$0xff] %v2603_v6  ;;  %v89_v32 = vld [vmem:[%s3534_s1 + $0x58] sm:$0xff] }
  0x38   :  { %281 = vmatpush1.bf16.msra.mxu0 %v2046_v12  ;;  %2021 = vmatpush1.bf16.msra.mxu1 %v2046_v12  ;;  %v87_v12 = vld [vmem:[%s3534_s1 + $0x48] sm:$0xff]  ;;  %v105_v35 = vld [vmem:[%s3534_s1 + $0xd8] sm:$0xff]  ;;  %v2656_v43 = vmul.f32 %v2490_v16, %v89_v32 }
  0x39   :  { %282 = vmatprep.subr.bf16.mxu0 %v2047_v13  ;;  %2014 = vmatprep.subr.bf16.mxu1 %v2047_v13  ;;  %v159_v13 = vpack.c.bf16 %v2603_v6, %v2600_v5  ;;  %v2626_v21 = vmul.f32 %v2490_v16, %v87_v12  ;;  %v2088_v47 = vld [vmem:[#allocation5 + $0xd4] ss:$8 sps:$4 sm:$0xff]   ;;  %v2095_v32 = vld [vmem:[#allocation5 + $0xa0] ss:$8 sps:$4 sm:$0xff]  }
  0x3a   :  { %v108_v12 = vld [vmem:[%s3534_s1 + $0xf0] sm:$0xff] }
  0x3c   :  { %283 = vmatpush1.bf16.msra.mxu0 %v2049_v15  ;;  %2022 = vmatpush1.bf16.msra.mxu1 %v2049_v15  ;;  %v102_v15 = vld [vmem:[%s3534_s1 + $0xc0] sm:$0xff] }
  0x3d   :  { %284 = vmatprep.subr.bf16.mxu0 %v2050_v17  ;;  %2015 = vmatprep.subr.bf16.mxu1 %v2050_v17  ;;  %v103_v17 = vld [vmem:[%s3534_s1 + $0xc8] sm:$0xff]  ;;  %v2630_v22 = vmul.f32 %v2490_v16, %v102_v15  ;;  %v2092_v15 = vld [vmem:[#allocation5 + $0xb0] ss:$8 sps:$4 sm:$0xff]  }
  0x3e   :  { %v2633_v23 = vmul.f32 %v2490_v16, %v103_v17 }
  0x3f   :  { %3556 = vst [vmem:[#allocation14_spill] sm:$0xff] %v2630_v22 }
  0x40   :  { %285 = vmatpush1.bf16.msra.mxu0 %v2052_v18  ;;  %2023 = vmatpush1.bf16.msra.mxu1 %v2052_v18  ;;  %v2074_v18 = vld [vmem:[#allocation5 + $0x10] ss:$8 sps:$4 sm:$0xff]   ;;  %3557 = vst [vmem:[#allocation15_spill] sm:$0xff] %v2633_v23  ;;  %v160_v33 = vpack.c.bf16 %v2633_v23, %v2630_v22 }
  0x41   :  { %286 = vmatprep.subr.bf16.mxu0 %v2053_v19  ;;  %2016 = vmatprep.subr.bf16.mxu1 %v2053_v19  ;;  %v2079_v19 = vld [vmem:[#allocation5 + $0x4] ss:$8 sps:$4 sm:$0xff]  }
  0x44   :  { %287 = vmatpush1.bf16.msra.mxu0 %v2055_v26  ;;  %2024 = vmatpush1.bf16.msra.mxu1 %v2055_v26  ;;  %v2077_v26 = vld [vmem:[#allocation5] ss:$8 sps:$4 sm:$0xff]  }
  0x45   :  { %765 = vmatprep.subr.bf16.mxu1 %v2058_v30  ;;  %v152_v30 = vpack.c.bf16 %v2626_v21, %v2623_v20 }
  0x47   :  { %305 = vmatmul.mubr.bf16.vlgmr.msra.gmra.mxu0 %v148_v31  ;;  %385 = vmatmul.mubr.bf16.vlgmr.msra.gmra.mxu1 %v156_v34  ;;  %v88_v31 = vld [vmem:[%s3534_s1 + $0x50] sm:$0xff] }
  0x48   :  { %314 = vmatprep.mubr.bf16.mxu0 %v2405_v0  ;;  %394 = vmatprep.mubr.bf16.mxu1 %v2405_v0  ;;  %v104_v34 = vld [vmem:[%s3534_s1 + $0xd0] sm:$0xff] }
  0x49   :  { %766 = vmatpush1.bf16.msra.mxu1 %v2056_v36  ;;  %v2080_v36 = vld [vmem:[#allocation5 + $0xf0] ss:$8 sps:$4 sm:$0xff]   ;;  %v2660_v44 = vmul.f32 %v2490_v16, %v104_v34 }
  0x4a   :  { %767 = vmatprep.subr.bf16.mxu1 %v2061_v37  ;;  %v2085_v37 = vld [vmem:[#allocation5 + $0xe4] ss:$8 sps:$4 sm:$0xff]   ;;  %v2098_v34 = vld [vmem:[#allocation5 + $0x90] ss:$8 sps:$4 sm:$0xff]  }
  0x4b   :  { %3558 = vst [vmem:[#allocation16_spill] sm:$0xff] %v2660_v44 }
  0x4d   :  { %768 = vmatpush1.bf16.msra.mxu1 %v2059_v42  ;;  %v2653_v42 = vmul.f32 %v2490_v16, %v88_v31  ;;  %v2097_v31 = vld [vmem:[#allocation5 + $0xa4] ss:$8 sps:$4 sm:$0xff]  }
  0x4e   :  { %769 = vmatprep.subr.bf16.mxu1 %v2064_v45  ;;  %v2663_v45 = vmul.f32 %v2490_v16, %v105_v35  ;;  %v2101_v35 = vld [vmem:[#allocation5 + $0x80] ss:$8 sps:$4 sm:$0xff]  }
  0x4f   :  { %315 = vmatmul.mubr.bf16.gmra.mxu0 %v149_v46  ;;  %395 = vmatmul.mubr.bf16.gmra.mxu1 %v157_v50  ;;  %v2083_v46 = vld [vmem:[#allocation5 + $0xe0] ss:$8 sps:$4 sm:$0xff]   ;;  %v153_v48 = vpack.c.bf16 %v2656_v43, %v2653_v42 }
  0x50   :  { %324 = vmatprep.mubr.bf16.mxu0 %v2405_v0  ;;  %404 = vmatprep.mubr.bf16.mxu1 %v2405_v0  ;;  %3559 = vst [vmem:[#allocation17_spill] sm:$0xff] %v2663_v45  ;;  %v91_v50 = vld [vmem:[%s3534_s1 + $0x68] sm:$0xff] }
  0x51   :  { %770 = vmatpush1.bf16.msra.mxu1 %v2062_v49  ;;  %v90_v49 = vld [vmem:[%s3534_s1 + $0x60] sm:$0xff]  ;;  %v2686_v61 = vmul.f32 %v2490_v16, %v91_v50 }
  0x52   :  { %771 = vmatprep.subr.bf16.mxu1 %v2067_v51  ;;  %v161_v51 = vpack.c.bf16 %v2663_v45, %v2660_v44 }
  0x55   :  { %772 = vmatpush1.bf16.msra.mxu1 %v2065_v54  ;;  %v106_v54 = vld [vmem:[%s3534_s1 + $0xe0] sm:$0xff] }
  0x56   :  { %773 = vmatprep.subr.bf16.mxu1 %v2070_v57  ;;  %v107_v57 = vld [vmem:[%s3534_s1 + $0xe8] sm:$0xff]  ;;  %v2690_v62 = vmul.f32 %v2490_v16, %v106_v54 }
  0x57   :  { %325 = vmatmul.mubr.bf16.gmra.mxu0 %v150_v60  ;;  %405 = vmatmul.mubr.bf16.gmra.mxu1 %v158_v1  ;;  %v2683_v60 = vmul.f32 %v2490_v16, %v90_v49  ;;  %v2089_v1 = vld [vmem:[#allocation5 + $0xc0] ss:$8 sps:$4 sm:$0xff]  }
  0x58   :  { %334 = vmatprep.mubr.bf16.mxu0 %v2405_v0  ;;  %414 = vmatprep.mubr.bf16.mxu1 %v2405_v0  ;;  %3560 = vst [vmem:[#allocation18_spill] sm:$0xff] %v2690_v62 }
  0x59   :  { %774 = vmatpush1.bf16.msra.mxu1 %v2068_v63  ;;  %v2693_v63 = vmul.f32 %v2490_v16, %v107_v57 }
  0x5a   :  { %775 = vmatprep.subr.bf16.mxu1 %v2073_v2  ;;  %v2094_v2 = vld [vmem:[#allocation5 + $0xb4] ss:$8 sps:$4 sm:$0xff]  }
  0x5b   :  { %3561 = vst [vmem:[#allocation19_spill] sm:$0xff] %v2693_v63  ;;  %v162_v10 = vpack.c.bf16 %v2693_v63, %v2690_v62 }
  0x5d   :  { %776 = vmatpush1.bf16.msra.mxu1 %v2071_v7  ;;  %v154_v7 = vpack.c.bf16 %v2686_v61, %v2683_v60 }
  0x5e   :  { %777 = vmatprep.subr.bf16.mxu1 %v2076_v8  ;;  %v92_v8 = vld [vmem:[%s3534_s1 + $0x70] sm:$0xff] }
  0x5f   :  { %335 = vmatmul.mubr.bf16.gmra.mxu0 %v151_v9  ;;  %415 = vmatmul.mubr.bf16.gmra.mxu1 %v159_v13  ;;  %v93_v9 = vld [vmem:[%s3534_s1 + $0x78] sm:$0xff]  ;;  %v2713_v17 = vmul.f32 %v2490_v16, %v92_v8 }
  0x60   :  { %344 = vmatprep.mubr.bf16.mxu0 %v2405_v0  ;;  %424 = vmatprep.mubr.bf16.mxu1 %v2405_v0  ;;  %v109_v13 = vld [vmem:[%s3534_s1 + $0xf8] sm:$0xff] }
  0x61   :  { %778 = vmatpush1.bf16.msra.mxu1 %v2074_v18  ;;  %v2716_v18 = vmul.f32 %v2490_v16, %v93_v9  ;;  %v2109_v9 = vld [vmem:[#allocation7 + $0x64] ss:$8 sps:$4 sm:$0xff]  }
  0x62   :  { %779 = vmatprep.subr.bf16.mxu1 %v2079_v19  ;;  %v2720_v19 = vmul.f32 %v2490_v16, %v108_v12 }
  0x64   :  { %3562 = vst [vmem:[#allocation20_spill] sm:$0xff] %v2720_v19 }
  0x65   :  { %780 = vmatpush1.bf16.msra.mxu1 %v2077_v26  ;;  %v2723_v26 = vmul.f32 %v2490_v16, %v109_v13  ;;  %v2103_v16 = vld [vmem:[#allocation5 + $0x84] ss:$8 sps:$4 sm:$0xff]  }
  0x66   :  { %781 = vmatprep.subr.bf16.mxu1 %v2082_v29  ;;  %v155_v29 = vpack.c.bf16 %v2716_v18, %v2713_v17 }
  0x67   :  { %345 = vmatmul.mubr.bf16.gmra.mxu0 %v152_v30  ;;  %425 = vmatmul.mubr.bf16.gmra.mxu1 %v160_v33  ;;  %3563 = vst [vmem:[#allocation21_spill] sm:$0xff] %v2723_v26  ;;  %v163_v30 = vpack.c.bf16 %v2723_v26, %v2720_v19  ;;  %v2100_v33 = vld [vmem:[#allocation5 + $0x94] ss:$8 sps:$4 sm:$0xff]  }
  0x68   :  { %354 = vmatprep.mubr.bf16.mxu0 %v2405_v0  ;;  %434 = vmatprep.mubr.bf16.mxu1 %v2405_v0 }
  0x69   :  { %782 = vmatpush2.bf16.msra.mxu1 %v2080_v36  ;;  %v180_v36 = vld [vmem:[%s3537_s4] sm:$0x3] }
  0x6a   :  { %783 = vmatprep.subr.bf16.mxu1 %v2085_v37 }
  0x6d   :  { %784 = vmatpush2.bf16.msra.mxu1 %v2083_v46 }
  0x6e   :  { %785 = vmatprep.subr.bf16.mxu1 %v2088_v47 }
  0x6f   :  { %355 = vmatmul.mubr.bf16.gmra.mxu0 %v153_v48  ;;  %435 = vmatmul.mubr.bf16.gmra.mxu1 %v161_v51  ;;  %v2742_v48 = vrot.slane %v180_v36, %v2485_v14 }
  0x70   :  { %364 = vmatprep.mubr.bf16.mxu0 %v2405_v0  ;;  %444 = vmatprep.mubr.bf16.mxu1 %v2405_v0 }
  0x71   :  { %786 = vmatpush2.bf16.msra.mxu1 %v2086_v58 }
  0x72   :  { %787 = vmatprep.subr.bf16.mxu1 %v2091_v59 }
  0x75   :  { %788 = vmatpush2.bf16.msra.mxu1 %v2089_v1  ;;  %v2104_v1 = vld [vmem:[#allocation7 + $0x70] ss:$8 sps:$4 sm:$0xff]  }
  0x76   :  { %789 = vmatprep.subr.bf16.mxu1 %v2094_v2  ;;  %v2106_v2 = vld [vmem:[#allocation7 + $0x74] ss:$8 sps:$4 sm:$0xff]  }
  0x77   :  { %365 = vmatmul.mubr.bf16.gmra.mxu0 %v154_v7  ;;  %445 = vmatmul.mubr.bf16.gmra.mxu1 %v162_v10 }
  0x78   :  { %374 = vmatprep.mubr.bf16.mxu0 %v2405_v0  ;;  %454 = vmatprep.mubr.bf16.mxu1 %v2405_v0  ;;  %v2731_v0 = vsub.s32 1, %v2482_v11 }
  0x79   :  { %790 = vmatpush2.bf16.msra.mxu1 %v2092_v15  ;;  %1258 = vmatprep.subr.bf16.mxu0 %v2106_v2 }
  0x7a   :  { %791 = vmatprep.subr.bf16.mxu1 %v2097_v31  ;;  %v2737_v46 = vrot.slane %v180_v36, %v2731_v0  ;;  %1259 = vmatpush1.bf16.msra.mxu0 %v2104_v1 }
  0x7b   :  { %1260 = vmatprep.subr.bf16.mxu0 %v2109_v9 }
  0x7d   :  { %792 = vmatpush2.bf16.msra.mxu1 %v2095_v32 }
  0x7e   :  { %793 = vmatprep.subr.bf16.mxu1 %v2100_v33  ;;  %v2112_v33 = vld [vmem:[#allocation7 + $0x54] ss:$8 sps:$4 sm:$0xff]  }
  0x7f   :  { %375 = vmatmul.mubr.bf16.gmra.mxu0 %v155_v29  ;;  %455 = vmatmul.mubr.bf16.gmra.mxu1 %v163_v30  ;;  %v2107_v30 = vld [vmem:[#allocation7 + $0x60] ss:$8 sps:$4 sm:$0xff]  }
  0x80   :  { %1261 = vmatpush1.bf16.msra.mxu0 %v2107_v30  ;;  %v2118_v30 = vld [vmem:[#allocation7 + $0x34] ss:$8 sps:$4 sm:$0xff]  }
  0x81   :  { %794 = vmatpush2.bf16.msra.mxu1 %v2098_v34  ;;  %1262 = vmatprep.subr.bf16.mxu0 %v2112_v33 }
  0x82   :  { %795 = vmatprep.subr.bf16.mxu1 %v2103_v16 }
  0x85   :  { %796 = vmatpush2.bf16.msra.mxu1 %v2101_v35 }
 0x107   :  { %v306_v37 = vpop.f32.mrf.mxu0  ;;  %v2739_v47 = vpop.f32.mrf.mxu1 }
 0x108   :  { %v307_v58 = vadd.f32 %v306_v37, %v2742_v48 }
 0x109   :  { %v308_v49 = vpop.f32.mrf.mxu0  ;;  %v2744_v50 = vpop.f32.mrf.mxu1 }
 0x10a   :  { %v309_v11 = vadd.f32 %v308_v49, %v2737_v46  ;;  %v465_v31 = vmax.f32 %v307_v58, 0.0 }
 0x10b   :  { %v310_v51 = vpop.f32.mrf.mxu0  ;;  %v2748_v57 = vpop.f32.mrf.mxu1 }
 0x10c   :  { %v311_v54 = vadd.f32 %v310_v51, %v2742_v48  ;;  %v466_v13 = vmax.f32 %v309_v11, 0.0  ;;  %v2110_v11 = vld [vmem:[#allocation7 + $0x50] ss:$8 sps:$4 sm:$0xff]  }
 0x10d   :  { %v312_v59 = vpop.f32.mrf.mxu0  ;;  %v2752_v8 = vpop.f32.mrf.mxu1  ;;  %1263 = vmatpush1.bf16.msra.mxu0 %v2110_v11 }
 0x10e   :  { %v313_v7 = vadd.f32 %v312_v59, %v2737_v46  ;;  %v467_v10 = vmax.f32 %v311_v54, 0.0  ;;  %v2115_v59 = vld [vmem:[#allocation7 + $0x44] ss:$8 sps:$4 sm:$0xff]  }
 0x10f   :  { %v316_v12 = vpop.f32.mrf.mxu0  ;;  %v2754_v29 = vpop.f32.mrf.mxu1  ;;  %1264 = vmatprep.subr.bf16.mxu0 %v2115_v59 }
 0x110   :  { %v468_v15 = vmax.f32 %v313_v7, 0.0  ;;  %v529_v35 = vpack.c.bf16 %v467_v10, %v465_v31  ;;  %v317_v54 = vadd.f32 %v316_v12, %v2742_v48 }
 0x111   :  { %v318_v32 = vpop.f32.mrf.mxu0  ;;  %v2756_v16 = vpop.f32.mrf.mxu1 }
 0x112   :  { %v530_v34 = vpack.c.bf16 %v468_v15, %v466_v13  ;;  %v319_v37 = vadd.f32 %v318_v32, %v2737_v46  ;;  %v2113_v15 = vld [vmem:[#allocation7 + $0x40] ss:$8 sps:$4 sm:$0xff]   ;;  %v469_v31 = vmax.f32 %v317_v54, 0.0  ;;  %v2121_v54 = vld [vmem:[#allocation7 + $0x24] ss:$8 sps:$4 sm:$0xff]  }
 0x113   :  { %v320_v36 = vpop.f32.mrf.mxu0  ;;  %v2760_v51 = vpop.f32.mrf.mxu1  ;;  %1265 = vmatpush1.bf16.msra.mxu0 %v2113_v15  ;;  %v2124_v15 = vld [vmem:[#allocation7 + $0x14] ss:$8 sps:$4 sm:$0xff]  }
 0x114   :  { %v321_v49 = vadd.f32 %v320_v36, %v2742_v48  ;;  %797 = vmatprep.mubr.bf16.mxu1 %v530_v34  ;;  %v470_v10 = vmax.f32 %v319_v37, 0.0  ;;  %1266 = vmatprep.subr.bf16.mxu0 %v2118_v30 }
 0x115   :  { %v322_v58 = vpop.f32.mrf.mxu0  ;;  %798 = vmatmul.mubr.bf16.vlgmr.msra.gmra.mxu1 %v529_v35  ;;  %v2764_v9 = vpop.f32.mrf.mxu1 }
 0x116   :  { %v323_v1 = vadd.f32 %v322_v58, %v2737_v46  ;;  %v471_v2 = vmax.f32 %v321_v49, 0.0  ;;  %v2116_v58 = vld [vmem:[#allocation7 + $0x30] ss:$8 sps:$4 sm:$0xff]  }
 0x117   :  { %v326_v7 = vpop.f32.mrf.mxu0  ;;  %v2766_v35 = vpop.f32.mrf.mxu1  ;;  %1267 = vmatpush1.bf16.msra.mxu0 %v2116_v58 }
 0x118   :  { %v472_v13 = vmax.f32 %v323_v1, 0.0  ;;  %v531_v12 = vpack.c.bf16 %v471_v2, %v469_v31  ;;  %v327_v37 = vadd.f32 %v326_v7, %v2742_v48  ;;  %1268 = vmatprep.subr.bf16.mxu0 %v2121_v54 }
 0x119   :  { %v328_v32 = vpop.f32.mrf.mxu0 }
 0x11a   :  { %v532_v34 = vpack.c.bf16 %v472_v13, %v470_v10  ;;  %v329_v33 = vadd.f32 %v328_v32, %v2737_v46  ;;  %v2772_v10 = vpop.f32.mrf.mxu1  ;;  %v2119_v32 = vld [vmem:[#allocation7 + $0x20] ss:$8 sps:$4 sm:$0xff]  }
 0x11b   :  { %v330_v36 = vpop.f32.mrf.mxu0  ;;  %1269 = vmatpush1.bf16.msra.mxu0 %v2119_v32  ;;  %v2130_v32 = vld [vmem:[#allocation7 + $0xf4] ss:$8 sps:$4 sm:$0xff]  }
 0x11c   :  { %v331_v49 = vadd.f32 %v330_v36, %v2742_v48  ;;  %807 = vmatprep.mubr.bf16.mxu1 %v532_v34  ;;  %v474_v13 = vmax.f32 %v329_v33, 0.0  ;;  %v473_v36 = vmax.f32 %v327_v37, 0.0  ;;  %1270 = vmatprep.subr.bf16.mxu0 %v2124_v15  ;;  %v2127_v37 = vld [vmem:[#allocation7 + $0x4] ss:$8 sps:$4 sm:$0xff]  }
 0x11d   :  { %v332_v11 = vpop.f32.mrf.mxu0  ;;  %808 = vmatmul.mubr.bf16.gmra.mxu1 %v531_v12  ;;  %v2774_v12 = vpop.f32.mrf.mxu1 }
 0x11e   :  { %v333_v59 = vadd.f32 %v332_v11, %v2737_v46  ;;  %v475_v1 = vmax.f32 %v331_v49, 0.0  ;;  %v2122_v11 = vld [vmem:[#allocation7 + $0x10] ss:$8 sps:$4 sm:$0xff]  }
 0x11f   :  { %v336_v2 = vpop.f32.mrf.mxu0  ;;  %1271 = vmatpush1.bf16.msra.mxu0 %v2122_v11 }
 0x120   :  { %v476_v31 = vmax.f32 %v333_v59, 0.0  ;;  %v533_v7 = vpack.c.bf16 %v475_v1, %v473_v36  ;;  %v337_v33 = vadd.f32 %v336_v2, %v2742_v48  ;;  %1272 = vmatprep.subr.bf16.mxu0 %v2127_v37 }
 0x121   :  { %v338_v34 = vpop.f32.mrf.mxu0 }
 0x122   :  { %v534_v26 = vpack.c.bf16 %v476_v31, %v474_v13  ;;  %v339_v30 = vadd.f32 %v338_v34, %v2737_v46  ;;  %v2780_v13 = vpop.f32.mrf.mxu1  ;;  %v2125_v34 = vld [vmem:[#allocation7] ss:$8 sps:$4 sm:$0xff]  }
 0x123   :  { %v340_v19 = vpop.f32.mrf.mxu0  ;;  %1273 = vmatpush1.bf16.msra.mxu0 %v2125_v34  ;;  %v2136_v34 = vld [vmem:[#allocation7 + $0xd4] ss:$8 sps:$4 sm:$0xff]  }
 0x124   :  { %v341_v49 = vadd.f32 %v340_v19, %v2742_v48  ;;  %817 = vmatprep.mubr.bf16.mxu1 %v534_v26  ;;  %v478_v31 = vmax.f32 %v339_v30, 0.0  ;;  %v477_v19 = vmax.f32 %v337_v33, 0.0  ;;  %1274 = vmatprep.subr.bf16.mxu0 %v2130_v32  ;;  %v2133_v33 = vld [vmem:[#allocation7 + $0xe4] ss:$8 sps:$4 sm:$0xff]  }
 0x125   :  { %v342_v58 = vpop.f32.mrf.mxu0  ;;  %818 = vmatmul.mubr.bf16.gmra.mxu1 %v533_v7  ;;  %v2782_v7 = vpop.f32.mrf.mxu1 }
 0x126   :  { %v343_v54 = vadd.f32 %v342_v58, %v2737_v46  ;;  %v479_v59 = vmax.f32 %v341_v49, 0.0  ;;  %v2128_v58 = vld [vmem:[#allocation7 + $0xf0] ss:$8 sps:$4 sm:$0xff]  }
 0x127   :  { %v346_v1 = vpop.f32.mrf.mxu0  ;;  %1275 = vmatpush2.bf16.msra.mxu0 %v2128_v58 }
 0x128   :  { %v480_v36 = vmax.f32 %v343_v54, 0.0  ;;  %v535_v2 = vpack.c.bf16 %v479_v59, %v477_v19  ;;  %v347_v30 = vadd.f32 %v346_v1, %v2742_v48  ;;  %1276 = vmatprep.subr.bf16.mxu0 %v2133_v33 }
 0x129   :  { %v348_v26 = vpop.f32.mrf.mxu0 }
 0x12a   :  { %v536_v63 = vpack.c.bf16 %v480_v36, %v478_v31  ;;  %v349_v15 = vadd.f32 %v348_v26, %v2737_v46  ;;  %v2788_v31 = vpop.f32.mrf.mxu1  ;;  %v2131_v26 = vld [vmem:[#allocation7 + $0xe0] ss:$8 sps:$4 sm:$0xff]  }
 0x12b   :  { %v350_v62 = vpop.f32.mrf.mxu0  ;;  %1277 = vmatpush2.bf16.msra.mxu0 %v2131_v26  ;;  %v2142_v26 = vld [vmem:[#allocation7 + $0xb4] ss:$8 sps:$4 sm:$0xff]  }
 0x12c   :  { %v351_v49 = vadd.f32 %v350_v62, %v2742_v48  ;;  %827 = vmatprep.mubr.bf16.mxu1 %v536_v63  ;;  %v482_v36 = vmax.f32 %v349_v15, 0.0  ;;  %v481_v62 = vmax.f32 %v347_v30, 0.0  ;;  %1278 = vmatprep.subr.bf16.mxu0 %v2136_v34  ;;  %v2139_v30 = vld [vmem:[#allocation7 + $0xc4] ss:$8 sps:$4 sm:$0xff]  }
 0x12d   :  { %v352_v11 = vpop.f32.mrf.mxu0  ;;  %828 = vmatmul.mubr.bf16.gmra.mxu1 %v535_v2  ;;  %v2790_v2 = vpop.f32.mrf.mxu1 }
 0x12e   :  { %v353_v37 = vadd.f32 %v352_v11, %v2737_v46  ;;  %v483_v54 = vmax.f32 %v351_v49, 0.0  ;;  %v2134_v11 = vld [vmem:[#allocation7 + $0xd0] ss:$8 sps:$4 sm:$0xff]  }
 0x12f   :  { %v356_v59 = vpop.f32.mrf.mxu0  ;;  %1279 = vmatpush2.bf16.msra.mxu0 %v2134_v11 }
 0x130   :  { %v484_v19 = vmax.f32 %v353_v37, 0.0  ;;  %v537_v1 = vpack.c.bf16 %v483_v54, %v481_v62  ;;  %v357_v15 = vadd.f32 %v356_v59, %v2742_v48  ;;  %1280 = vmatprep.subr.bf16.mxu0 %v2139_v30 }
 0x131   :  { %v358_v63 = vpop.f32.mrf.mxu0 }
 0x132   :  { %v538_v45 = vpack.c.bf16 %v484_v19, %v482_v36  ;;  %v359_v32 = vadd.f32 %v358_v63, %v2737_v46  ;;  %v2796_v36 = vpop.f32.mrf.mxu1  ;;  %v2137_v63 = vld [vmem:[#allocation7 + $0xc0] ss:$8 sps:$4 sm:$0xff]  }
 0x133   :  { %v360_v44 = vpop.f32.mrf.mxu0  ;;  %1281 = vmatpush2.bf16.msra.mxu0 %v2137_v63 }
 0x134   :  { %v361_v49 = vadd.f32 %v360_v44, %v2742_v48  ;;  %837 = vmatprep.mubr.bf16.mxu1 %v538_v45  ;;  %v486_v19 = vmax.f32 %v359_v32, 0.0  ;;  %v485_v44 = vmax.f32 %v357_v15, 0.0  ;;  %1282 = vmatprep.subr.bf16.mxu0 %v2142_v26 }
 0x135   :  { %v362_v58 = vpop.f32.mrf.mxu0  ;;  %838 = vmatmul.mubr.bf16.gmra.mxu1 %v537_v1  ;;  %v2798_v1 = vpop.f32.mrf.mxu1 }
 0x136   :  { %v363_v33 = vadd.f32 %v362_v58, %v2737_v46  ;;  %v487_v37 = vmax.f32 %v361_v49, 0.0  ;;  %v2140_v58 = vld [vmem:[#allocation7 + $0xb0] ss:$8 sps:$4 sm:$0xff]  }
 0x137   :  { %v366_v54 = vpop.f32.mrf.mxu0  ;;  %1283 = vmatpush2.bf16.msra.mxu0 %v2140_v58 }
 0x138   :  { %v488_v62 = vmax.f32 %v363_v33, 0.0  ;;  %v539_v59 = vpack.c.bf16 %v487_v37, %v485_v44  ;;  %v367_v32 = vadd.f32 %v366_v54, %v2742_v48  ;;  %v2804_v37 = vpop.f32.mrf.mxu1  ;;  %v393_v54 = vadd.f32 %v2752_v8, %v2737_v46 }
 0x139   :  { %v368_v45 = vpop.f32.mrf.mxu0 }
 0x13a   :  { %v540_v23 = vpack.c.bf16 %v488_v62, %v486_v19  ;;  %v369_v34 = vadd.f32 %v368_v45, %v2737_v46  ;;  %v489_v44 = vmax.f32 %v367_v32, 0.0 }
 0x13b   :  { %v370_v22 = vpop.f32.mrf.mxu0 }
 0x13c   :  { %v371_v49 = vadd.f32 %v370_v22, %v2742_v48  ;;  %847 = vmatprep.mubr.bf16.mxu1 %v540_v23  ;;  %v490_v19 = vmax.f32 %v369_v34, 0.0  ;;  %v389_v23 = vadd.f32 %v2744_v50, %v2737_v46  ;;  %v500_v50 = vmax.f32 %v393_v54, 0.0 }
 0x13d   :  { %v372_v11 = vpop.f32.mrf.mxu0  ;;  %848 = vmatmul.mubr.bf16.gmra.mxu1 %v539_v59  ;;  %v2810_v59 = vpop.f32.mrf.mxu1  ;;  %v391_v54 = vadd.f32 %v2748_v57, %v2742_v48  ;;  %v397_v57 = vadd.f32 %v2754_v29, %v2742_v48  ;;  %v419_v29 = vadd.f32 %v2788_v31, %v2737_v46  ;;  %v2149_v31 = vld [vmem:[#allocation7 + $0x80] ss:$8 sps:$4 sm:$0xff]  }
 0x13e   :  { %v373_v15 = vadd.f32 %v372_v11, %v2737_v46  ;;  %v491_v30 = vmax.f32 %v371_v49, 0.0  ;;  %v498_v32 = vmax.f32 %v389_v23, 0.0 }
 0x13f   :  { %v376_v33 = vpop.f32.mrf.mxu0 }
 0x140   :  { %v492_v62 = vmax.f32 %v373_v15, 0.0  ;;  %v541_v63 = vpack.c.bf16 %v491_v30, %v489_v44  ;;  %v377_v34 = vadd.f32 %v376_v33, %v2742_v48  ;;  %v546_v5 = vpack.c.bf16 %v500_v50, %v498_v32 }
 0x141   :  { %v378_v45 = vpop.f32.mrf.mxu0  ;;  %v387_v33 = vadd.f32 %v2739_v47, %v2742_v48  ;;  %v413_v47 = vadd.f32 %v2780_v13, %v2737_v46  ;;  %v2148_v13 = vld [vmem:[#allocation7 + $0x94] ss:$8 sps:$4 sm:$0xff]  }
 0x142   :  { %v542_v22 = vpack.c.bf16 %v492_v62, %v490_v19  ;;  %v379_v49 = vadd.f32 %v378_v45, %v2737_v46  ;;  %v432_v62 = vpop.f32.mrf.mxu1  ;;  %v493_v44 = vmax.f32 %v377_v34, 0.0  ;;  %v399_v45 = vadd.f32 %v2756_v16, %v2737_v46 }
 0x143   :  { %v380_v26 = vpop.f32.mrf.mxu0  ;;  %v499_v34 = vmax.f32 %v391_v54, 0.0  ;;  %v411_v54 = vadd.f32 %v2774_v12, %v2742_v48  ;;  %v433_v12 = vadd.f32 %v432_v62, %v2737_v46 }
 0x144   :  { %v381_v11 = vadd.f32 %v380_v26, %v2742_v48  ;;  %857 = vmatprep.mubr.bf16.mxu1 %v542_v22  ;;  %v494_v8 = vmax.f32 %v379_v49, 0.0  ;;  %v403_v22 = vadd.f32 %v2764_v9, %v2737_v46  ;;  %v502_v26 = vmax.f32 %v399_v45, 0.0 }
 0x145   :  { %v382_v58 = vpop.f32.mrf.mxu0  ;;  %858 = vmatmul.mubr.bf16.gmra.mxu1 %v541_v63  ;;  %v2824_v63 = vpop.f32.mrf.mxu1  ;;  %v409_v9 = vadd.f32 %v2772_v10, %v2737_v46 }
 0x146   :  { %v383_v15 = vadd.f32 %v382_v58, %v2737_v46  ;;  %v495_v19 = vmax.f32 %v381_v11, 0.0  ;;  %v504_v49 = vmax.f32 %v403_v22, 0.0  ;;  %v497_v11 = vmax.f32 %v387_v33, 0.0  ;;  %v2146_v22 = vld [vmem:[#allocation7 + $0x90] ss:$8 sps:$4 sm:$0xff]  }
 0x147   :  { %v438_v16 = vpop.f32.mrf.mxu1  ;;  %v506_v50 = vmax.f32 %v409_v9, 0.0  ;;  %v507_v9 = vmax.f32 %v411_v54, 0.0 }
 0x148   :  { %v496_v30 = vmax.f32 %v383_v15, 0.0  ;;  %v543_v23 = vpack.c.bf16 %v495_v19, %v493_v44  ;;  %v548_v58 = vpack.c.bf16 %v504_v49, %v502_v26  ;;  %v545_v32 = vpack.c.bf16 %v499_v34, %v497_v11  ;;  %v2151_v49 = vld [vmem:[#allocation7 + $0x84] ss:$8 sps:$4 sm:$0xff]  }
 0x149   :  { %v2834_v15 = vpop.f32.mrf.mxu1  ;;  %v508_v19 = vmax.f32 %v413_v47, 0.0  ;;  %v510_v11 = vmax.f32 %v419_v29, 0.0 }
 0x14a   :  { %v544_v6 = vpack.c.bf16 %v496_v30, %v494_v8  ;;  %v2143_v8 = vld [vmem:[#allocation7 + $0xa0] ss:$8 sps:$4 sm:$0xff]   ;;  %v501_v30 = vmax.f32 %v397_v57, 0.0  ;;  %v417_v57 = vadd.f32 %v2782_v7, %v2742_v48  ;;  %v427_v7 = vadd.f32 %v2798_v1, %v2742_v48 }
 0x14b   :  { %v442_v44 = vpop.f32.mrf.mxu1  ;;  %v550_v45 = vpack.c.bf16 %v508_v19, %v506_v50  ;;  %v516_v19 = vmax.f32 %v433_v12, 0.0  ;;  %v437_v1 = vadd.f32 %v2824_v63, %v2742_v48 }
 0x14c   :  { %867 = vmatprep.mubr.bf16.mxu1 %v544_v6  ;;  %v401_v6 = vadd.f32 %v2760_v51, %v2742_v48  ;;  %v423_v51 = vadd.f32 %v2796_v36, %v2737_v46  ;;  %v443_v62 = vadd.f32 %v442_v44, %v2737_v46 }
 0x14d   :  { %868 = vmatmul.mubr.bf16.gmra.mxu1 %v543_v23  ;;  %v407_v23 = vadd.f32 %v2766_v35, %v2742_v48  ;;  %v446_v26 = vpop.f32.mrf.mxu1  ;;  %v429_v35 = vadd.f32 %v2804_v37, %v2737_v46  ;;  %v439_v37 = vadd.f32 %v438_v16, %v2737_v46 }
 0x14e   :  { %877 = vmatprep.mubr.bf16.mxu1 %v546_v5  ;;  %v2145_v5 = vld [vmem:[#allocation7 + $0xa4] ss:$8 sps:$4 sm:$0xff]   ;;  %v503_v10 = vmax.f32 %v401_v6, 0.0  ;;  %v512_v34 = vmax.f32 %v423_v51, 0.0  ;;  %v421_v6 = vadd.f32 %v2790_v2, %v2742_v48  ;;  %v431_v2 = vadd.f32 %v2810_v59, %v2742_v48 }
 0x14f   :  { %1284 = vmatprep.subr.bf16.mxu0 %v2145_v5  ;;  %v448_v36 = vpop.f32.mrf.mxu1  ;;  %v514_v50 = vmax.f32 %v429_v35, 0.0  ;;  %v518_v51 = vmax.f32 %v439_v37, 0.0  ;;  %v441_v59 = vadd.f32 %v2834_v15, %v2742_v48 }
 0x150   :  { %1285 = vmatpush2.bf16.msra.mxu0 %v2143_v8  ;;  %v547_v33 = vpack.c.bf16 %v503_v10, %v501_v30  ;;  %v552_v47 = vpack.c.bf16 %v512_v34, %v510_v11  ;;  %v509_v8 = vmax.f32 %v417_v57, 0.0  ;;  %v511_v30 = vmax.f32 %v421_v6, 0.0 }
 0x151   :  { %1286 = vmatprep.subr.bf16.mxu0 %v2148_v13  ;;  %v450_v5 = vpop.f32.mrf.mxu1  ;;  %v554_v13 = vpack.c.bf16 %v516_v19, %v514_v50  ;;  %v449_v16 = vadd.f32 %v448_v36, %v2737_v46  ;;  %v447_v6 = vadd.f32 %v446_v26, %v2742_v48  ;;  %v593_v26 = vld [vmem:[%s3539_s6] sm:$0x3]  ;;  %s1912_s6 = sshll.u32 %s2406_s12, 4  ;;  %s1913_s6 = int_to_ptr.vmem [resolvable:$true] %s1912_s6 }
 0x152   :  { %v451_v63 = vadd.f32 %v450_v5, %v2742_v48  ;;  %s2374_s20 = scalar_lea.vmem %s1913_s6, 4096  ;;  %p2379_p2 = scmp.lt.s32.totalorder %s1913_s6, %s1913_s6 }
 0x153   :  { %v452_v10 = vpop.f32.mrf.mxu1  ;;  %v521_v19 = vmax.f32 %v447_v6, 0.0  ;;  %p2375_p1 = scmp.ne.s32.totalorder %s1913_s6, %s2374_s20  ;;  %p2380_p3 = scmp.lt.s32.totalorder %s2374_s20, %s2374_s20 }
 0x154   :  { %1287 = vmatpush2.bf16.msra.mxu0 %v2146_v22  ;;  %v520_v22 = vmax.f32 %v443_v62, 0.0  ;;  %v453_v44 = vadd.f32 %v452_v10, %v2737_v46 }
 0x155   :  { %878 = vmatmul.mubr.bf16.gmra.mxu1 %v545_v32  ;;  %1288 = vmatprep.subr.bf16.mxu0 %v2151_v49  ;;  %v456_v29 = vpop.f32.mrf.mxu1  ;;  %p2381_p4 = por %p2380_p3, %p2379_p2 }
 0x156   :  { %887 = vmatprep.mubr.bf16.mxu1 %v548_v58  ;;  %v505_v58 = vmax.f32 %v407_v23, 0.0  ;;  %v515_v23 = vmax.f32 %v431_v2, 0.0  ;;  %v556_v49 = vpack.c.bf16 %v520_v22, %v518_v51  ;;  %v2876_v2 = vrot.slane %v593_v26, %v2485_v14 }
 0x157   :  { %v458_v54 = vpop.f32.mrf.mxu1  ;;  %p2382_p5 = pnand %p2381_p4, %p2375_p1 }
 0x158   :  { %1289 = vmatpush2.bf16.msra.mxu0 %v2149_v31  ;;  %v549_v32 = vpack.c.bf16 %v507_v9, %v505_v58  ;;  %v522_v31 = vmax.f32 %v449_v16, 0.0  ;;  %v524_v58 = vmax.f32 %v453_v44, 0.0  ;;  %v517_v9 = vmax.f32 %v437_v1, 0.0 }
 0x159   :  { %v460_v34 = vpop.f32.mrf.mxu1  ;;  %v459_v36 = vadd.f32 %v458_v54, %v2737_v46 }
 0x15a   :  { %v558_v12 = vpack.c.bf16 %v524_v58, %v522_v31  ;;  %v461_v37 = vadd.f32 %v460_v34, %v2742_v48 }
 0x15b   :  { %v462_v35 = vpop.f32.mrf.mxu1  ;;  %v526_v15 = vmax.f32 %v459_v36, 0.0 }
 0x15c   :  { %v527_v62 = vmax.f32 %v461_v37, 0.0 }
 0x15d   :  { %888 = vmatmul.mubr.bf16.gmra.mxu1 %v547_v33  ;;  %v513_v33 = vmax.f32 %v427_v7, 0.0  ;;  %v2873_v7 = vrot.slane %v593_v26, %v2731_v0 }
 0x15e   :  { %897 = vmatprep.mubr.bf16.mxu1 %v550_v45  ;;  %v551_v45 = vpack.c.bf16 %v511_v30, %v509_v8  ;;  %v523_v8 = vmax.f32 %v451_v63, 0.0 }
 0x15f   :  { %v553_v11 = vpack.c.bf16 %v515_v23, %v513_v33 }
 0x160   :  { %v557_v10 = vpack.c.bf16 %v523_v8, %v521_v19 }
 0x165   :  { %898 = vmatmul.mubr.bf16.gmra.mxu1 %v549_v32  ;;  %v463_v32 = vadd.f32 %v462_v35, %v2737_v46 }
 0x166   :  { %907 = vmatprep.mubr.bf16.mxu1 %v552_v47  ;;  %v519_v47 = vmax.f32 %v441_v59, 0.0 }
 0x167   :  { %v528_v50 = vmax.f32 %v463_v32, 0.0 }
 0x168   :  { %v555_v57 = vpack.c.bf16 %v519_v47, %v517_v9 }
 0x169   :  { %v560_v30 = vpack.c.bf16 %v528_v50, %v526_v15 }
 0x16d   :  { %908 = vmatmul.mubr.bf16.gmra.mxu1 %v551_v45 }
 0x16e   :  { %917 = vmatprep.mubr.bf16.mxu1 %v554_v13  ;;  %v457_v13 = vadd.f32 %v456_v29, %v2742_v48 }
 0x170   :  { %v525_v46 = vmax.f32 %v457_v13, 0.0 }
 0x172   :  { %v559_v45 = vpack.c.bf16 %v527_v62, %v525_v46 }
 0x175   :  { %918 = vmatmul.mubr.bf16.gmra.mxu1 %v553_v11 }
 0x176   :  { %927 = vmatprep.mubr.bf16.mxu1 %v556_v49 }
 0x17d   :  { %928 = vmatmul.mubr.bf16.gmra.mxu1 %v555_v57 }
 0x17e   :  { %937 = vmatprep.mubr.bf16.mxu1 %v558_v12 }
 0x185   :  { %938 = vmatmul.mubr.bf16.gmra.mxu1 %v557_v10 }
 0x186   :  { %947 = vmatprep.mubr.bf16.mxu1 %v560_v30 }
 0x18d   :  { %948 = vmatmul.mubr.bf16.gmra.mxu1 %v559_v45 }
 0x1d5   :  { %v799_v5 = vpop.f32.mrf.mxu1 }
 0x1d6   :  { %v800_v33 = vadd.f32 %v799_v5, %v2876_v2 }
 0x1d7   :  { %v801_v29 = vpop.f32.mrf.mxu1 }
 0x1d8   :  { %v802_v48 = vadd.f32 %v801_v29, %v2873_v7  ;;  %v958_v1 = vmax.f32 %v800_v33, 0.0 }
 0x1d9   :  { %v803_v51 = vpop.f32.mrf.mxu1 }
 0x1da   :  { %v804_v22 = vadd.f32 %v803_v51, %v2876_v2  ;;  %v959_v44 = vmax.f32 %v802_v48, 0.0 }
 0x1db   :  { %v805_v23 = vpop.f32.mrf.mxu1 }
 0x1dc   :  { %v806_v54 = vadd.f32 %v805_v23, %v2873_v7  ;;  %v960_v49 = vmax.f32 %v804_v22, 0.0 }
 0x1dd   :  { %v809_v16 = vpop.f32.mrf.mxu1 }
 0x1de   :  { %v961_v11 = vmax.f32 %v806_v54, 0.0  ;;  %v1022_v31 = vpack.c.bf16 %v960_v49, %v958_v1  ;;  %v810_v35 = vadd.f32 %v809_v16, %v2876_v2 }
 0x1df   :  { %v811_v59 = vpop.f32.mrf.mxu1 }
 0x1e0   :  { %v1023_v34 = vpack.c.bf16 %v961_v11, %v959_v44  ;;  %v812_v9 = vadd.f32 %v811_v59, %v2873_v7  ;;  %v962_v15 = vmax.f32 %v810_v35, 0.0 }
 0x1e1   :  { %v813_v58 = vpop.f32.mrf.mxu1 }
 0x1e2   :  { %v814_v47 = vadd.f32 %v813_v58, %v2876_v2  ;;  %1290 = vmatprep.mubr.bf16.mxu0 %v1023_v34  ;;  %v963_v6 = vmax.f32 %v812_v9, 0.0 }
 0x1e3   :  { %v815_v12 = vpop.f32.mrf.mxu1  ;;  %1291 = vmatmul.mubr.bf16.vlgmr.msra.gmra.mxu0 %v1022_v31 }
 0x1e4   :  { %v816_v36 = vadd.f32 %v815_v12, %v2873_v7  ;;  %v964_v32 = vmax.f32 %v814_v47, 0.0 }
 0x1e5   :  { %v819_v57 = vpop.f32.mrf.mxu1 }
 0x1e6   :  { %v965_v63 = vmax.f32 %v816_v36, 0.0  ;;  %v1024_v8 = vpack.c.bf16 %v964_v32, %v962_v15  ;;  %v820_v37 = vadd.f32 %v819_v57, %v2876_v2 }
 0x1e7   :  { %v821_v50 = vpop.f32.mrf.mxu1 }
 0x1e8   :  { %v1025_v19 = vpack.c.bf16 %v965_v63, %v963_v6  ;;  %v822_v10 = vadd.f32 %v821_v50, %v2873_v7  ;;  %v966_v51 = vmax.f32 %v820_v37, 0.0 }
 0x1e9   :  { %v823_v30 = vpop.f32.mrf.mxu1 }
 0x1ea   :  { %v824_v13 = vadd.f32 %v823_v30, %v2876_v2  ;;  %1300 = vmatprep.mubr.bf16.mxu0 %v1025_v19  ;;  %v967_v5 = vmax.f32 %v822_v10, 0.0 }
 0x1eb   :  { %v825_v46 = vpop.f32.mrf.mxu1  ;;  %1301 = vmatmul.mubr.bf16.gmra.mxu0 %v1024_v8 }
 0x1ec   :  { %v826_v62 = vadd.f32 %v825_v46, %v2873_v7  ;;  %v968_v45 = vmax.f32 %v824_v13, 0.0 }
 0x1ed   :  { %v829_v26 = vpop.f32.mrf.mxu1 }
 0x1ee   :  { %v969_v29 = vmax.f32 %v826_v62, 0.0  ;;  %v1026_v33 = vpack.c.bf16 %v968_v45, %v966_v51  ;;  %v830_v16 = vadd.f32 %v829_v26, %v2876_v2 }
 0x1ef   :  { %v831_v48 = vpop.f32.mrf.mxu1 }
 0x1f0   :  { %v1027_v22 = vpack.c.bf16 %v969_v29, %v967_v5  ;;  %v832_v54 = vadd.f32 %v831_v48, %v2873_v7  ;;  %v970_v58 = vmax.f32 %v830_v16, 0.0 }
 0x1f1   :  { %v833_v23 = vpop.f32.mrf.mxu1 }
 0x1f2   :  { %v834_v49 = vadd.f32 %v833_v23, %v2876_v2  ;;  %1310 = vmatprep.mubr.bf16.mxu0 %v1027_v22  ;;  %v971_v34 = vmax.f32 %v832_v54, 0.0 }
 0x1f3   :  { %v835_v44 = vpop.f32.mrf.mxu1  ;;  %1311 = vmatmul.mubr.bf16.gmra.mxu0 %v1026_v33 }
 0x1f4   :  { %v836_v11 = vadd.f32 %v835_v44, %v2873_v7  ;;  %v972_v1 = vmax.f32 %v834_v49, 0.0 }
 0x1f5   :  { %v839_v59 = vpop.f32.mrf.mxu1 }
 0x1f6   :  { %v973_v31 = vmax.f32 %v836_v11, 0.0  ;;  %v1028_v35 = vpack.c.bf16 %v972_v1, %v970_v58  ;;  %v840_v57 = vadd.f32 %v839_v59, %v2876_v2 }
 0x1f7   :  { %v841_v9 = vpop.f32.mrf.mxu1 }
 0x1f8   :  { %v1029_v47 = vpack.c.bf16 %v973_v31, %v971_v34  ;;  %v842_v36 = vadd.f32 %v841_v9, %v2873_v7  ;;  %v974_v30 = vmax.f32 %v840_v57, 0.0 }
 0x1f9   :  { %v843_v12 = vpop.f32.mrf.mxu1 }
 0x1fa   :  { %v844_v32 = vadd.f32 %v843_v12, %v2876_v2  ;;  %1320 = vmatprep.mubr.bf16.mxu0 %v1029_v47  ;;  %v975_v19 = vmax.f32 %v842_v36, 0.0 }
 0x1fb   :  { %v845_v6 = vpop.f32.mrf.mxu1  ;;  %1321 = vmatmul.mubr.bf16.gmra.mxu0 %v1028_v35 }
 0x1fc   :  { %v846_v63 = vadd.f32 %v845_v6, %v2873_v7  ;;  %v976_v15 = vmax.f32 %v844_v32, 0.0 }
 0x1fd   :  { %v849_v50 = vpop.f32.mrf.mxu1 }
 0x1fe   :  { %v977_v8 = vmax.f32 %v846_v63, 0.0  ;;  %v1030_v37 = vpack.c.bf16 %v976_v15, %v974_v30  ;;  %v850_v26 = vadd.f32 %v849_v50, %v2876_v2 }
 0x1ff   :  { %v851_v10 = vpop.f32.mrf.mxu1 }
 0x200   :  { %v1031_v13 = vpack.c.bf16 %v977_v8, %v975_v19  ;;  %v852_v62 = vadd.f32 %v851_v10, %v2873_v7  ;;  %v978_v23 = vmax.f32 %v850_v26, 0.0 }
 0x201   :  { %v853_v46 = vpop.f32.mrf.mxu1 }
 0x202   :  { %v854_v45 = vadd.f32 %v853_v46, %v2876_v2  ;;  %1330 = vmatprep.mubr.bf16.mxu0 %v1031_v13  ;;  %v979_v22 = vmax.f32 %v852_v62, 0.0 }
 0x203   :  { %v855_v5 = vpop.f32.mrf.mxu1  ;;  %1331 = vmatmul.mubr.bf16.gmra.mxu0 %v1030_v37 }
 0x204   :  { %v856_v29 = vadd.f32 %v855_v5, %v2873_v7  ;;  %v980_v51 = vmax.f32 %v854_v45, 0.0 }
 0x205   :  { %v859_v48 = vpop.f32.mrf.mxu1 }
 0x206   :  { %v981_v33 = vmax.f32 %v856_v29, 0.0  ;;  %v1032_v16 = vpack.c.bf16 %v980_v51, %v978_v23  ;;  %v860_v59 = vadd.f32 %v859_v48, %v2876_v2 }
 0x207   :  { %v861_v54 = vpop.f32.mrf.mxu1 }
 0x208   :  { %v1033_v49 = vpack.c.bf16 %v981_v33, %v979_v22  ;;  %v862_v11 = vadd.f32 %v861_v54, %v2873_v7  ;;  %v982_v12 = vmax.f32 %v860_v59, 0.0 }
 0x209   :  { %v863_v44 = vpop.f32.mrf.mxu1 }
 0x20a   :  { %v864_v1 = vadd.f32 %v863_v44, %v2876_v2  ;;  %1340 = vmatprep.mubr.bf16.mxu0 %v1033_v49  ;;  %v983_v47 = vmax.f32 %v862_v11, 0.0 }
 0x20b   :  { %v865_v34 = vpop.f32.mrf.mxu1  ;;  %1341 = vmatmul.mubr.bf16.gmra.mxu0 %v1032_v16 }
 0x20c   :  { %v866_v31 = vadd.f32 %v865_v34, %v2873_v7  ;;  %v984_v58 = vmax.f32 %v864_v1, 0.0 }
 0x20d   :  { %v869_v9 = vpop.f32.mrf.mxu1 }
 0x20e   :  { %v985_v35 = vmax.f32 %v866_v31, 0.0  ;;  %v1034_v57 = vpack.c.bf16 %v984_v58, %v982_v12  ;;  %v870_v50 = vadd.f32 %v869_v9, %v2876_v2 }
 0x20f   :  { %v871_v36 = vpop.f32.mrf.mxu1 }
 0x210   :  { %v1035_v32 = vpack.c.bf16 %v985_v35, %v983_v47  ;;  %v872_v63 = vadd.f32 %v871_v36, %v2873_v7  ;;  %v986_v46 = vmax.f32 %v870_v50, 0.0 }
 0x211   :  { %v873_v6 = vpop.f32.mrf.mxu1 }
 0x212   :  { %v874_v15 = vadd.f32 %v873_v6, %v2876_v2  ;;  %1350 = vmatprep.mubr.bf16.mxu0 %v1035_v32  ;;  %v987_v13 = vmax.f32 %v872_v63, 0.0 }
 0x213   :  { %v875_v19 = vpop.f32.mrf.mxu1  ;;  %1351 = vmatmul.mubr.bf16.gmra.mxu0 %v1034_v57 }
 0x214   :  { %v876_v8 = vadd.f32 %v875_v19, %v2873_v7  ;;  %v988_v30 = vmax.f32 %v874_v15, 0.0 }
 0x215   :  { %v879_v10 = vpop.f32.mrf.mxu1 }
 0x216   :  { %v989_v37 = vmax.f32 %v876_v8, 0.0  ;;  %v1036_v26 = vpack.c.bf16 %v988_v30, %v986_v46  ;;  %v880_v48 = vadd.f32 %v879_v10, %v2876_v2 }
 0x217   :  { %v881_v62 = vpop.f32.mrf.mxu1 }
 0x218   :  { %v1037_v45 = vpack.c.bf16 %v989_v37, %v987_v13  ;;  %v882_v29 = vadd.f32 %v881_v62, %v2873_v7  ;;  %v990_v44 = vmax.f32 %v880_v48, 0.0 }
 0x219   :  { %v883_v5 = vpop.f32.mrf.mxu1 }
 0x21a   :  { %v884_v51 = vadd.f32 %v883_v5, %v2876_v2  ;;  %1360 = vmatprep.mubr.bf16.mxu0 %v1037_v45  ;;  %v991_v49 = vmax.f32 %v882_v29, 0.0 }
 0x21b   :  { %v885_v22 = vpop.f32.mrf.mxu1  ;;  %1361 = vmatmul.mubr.bf16.gmra.mxu0 %v1036_v26 }
 0x21c   :  { %v886_v33 = vadd.f32 %v885_v22, %v2873_v7  ;;  %v992_v23 = vmax.f32 %v884_v51, 0.0 }
 0x21d   :  { %v889_v54 = vpop.f32.mrf.mxu1 }
 0x21e   :  { %v993_v16 = vmax.f32 %v886_v33, 0.0  ;;  %v1038_v59 = vpack.c.bf16 %v992_v23, %v990_v44  ;;  %v890_v9 = vadd.f32 %v889_v54, %v2876_v2 }
 0x21f   :  { %v891_v11 = vpop.f32.mrf.mxu1 }
 0x220   :  { %v1039_v1 = vpack.c.bf16 %v993_v16, %v991_v49  ;;  %v892_v31 = vadd.f32 %v891_v11, %v2873_v7  ;;  %v994_v6 = vmax.f32 %v890_v9, 0.0 }
 0x221   :  { %v893_v34 = vpop.f32.mrf.mxu1 }
 0x222   :  { %v894_v58 = vadd.f32 %v893_v34, %v2876_v2  ;;  %1370 = vmatprep.mubr.bf16.mxu0 %v1039_v1  ;;  %v995_v32 = vmax.f32 %v892_v31, 0.0 }
 0x223   :  { %v895_v47 = vpop.f32.mrf.mxu1  ;;  %1371 = vmatmul.mubr.bf16.gmra.mxu0 %v1038_v59 }
 0x224   :  { %v896_v35 = vadd.f32 %v895_v47, %v2873_v7  ;;  %v996_v12 = vmax.f32 %v894_v58, 0.0 }
 0x225   :  { %v899_v36 = vpop.f32.mrf.mxu1 }
 0x226   :  { %v997_v57 = vmax.f32 %v896_v35, 0.0  ;;  %v1040_v50 = vpack.c.bf16 %v996_v12, %v994_v6  ;;  %v900_v10 = vadd.f32 %v899_v36, %v2876_v2 }
 0x227   :  { %v901_v63 = vpop.f32.mrf.mxu1 }
 0x228   :  { %v1041_v15 = vpack.c.bf16 %v997_v57, %v995_v32  ;;  %v902_v8 = vadd.f32 %v901_v63, %v2873_v7  ;;  %v998_v5 = vmax.f32 %v900_v10, 0.0 }
 0x229   :  { %v903_v19 = vpop.f32.mrf.mxu1 }
 0x22a   :  { %v904_v30 = vadd.f32 %v903_v19, %v2876_v2  ;;  %1380 = vmatprep.mubr.bf16.mxu0 %v1041_v15  ;;  %v999_v45 = vmax.f32 %v902_v8, 0.0 }
 0x22b   :  { %v905_v13 = vpop.f32.mrf.mxu1  ;;  %1381 = vmatmul.mubr.bf16.gmra.mxu0 %v1040_v50 }
 0x22c   :  { %v906_v37 = vadd.f32 %v905_v13, %v2873_v7  ;;  %v1000_v46 = vmax.f32 %v904_v30, 0.0 }
 0x22d   :  { %v909_v62 = vpop.f32.mrf.mxu1 }
 0x22e   :  { %v1001_v26 = vmax.f32 %v906_v37, 0.0  ;;  %v1042_v48 = vpack.c.bf16 %v1000_v46, %v998_v5  ;;  %v910_v54 = vadd.f32 %v909_v62, %v2876_v2 }
 0x22f   :  { %v911_v29 = vpop.f32.mrf.mxu1 }
 0x230   :  { %v1043_v51 = vpack.c.bf16 %v1001_v26, %v999_v45  ;;  %v912_v33 = vadd.f32 %v911_v29, %v2873_v7  ;;  %v1002_v34 = vmax.f32 %v910_v54, 0.0 }
 0x231   :  { %v913_v22 = vpop.f32.mrf.mxu1 }
 0x232   :  { %v914_v23 = vadd.f32 %v913_v22, %v2876_v2  ;;  %1390 = vmatprep.mubr.bf16.mxu0 %v1043_v51  ;;  %v1003_v1 = vmax.f32 %v912_v33, 0.0 }
 0x233   :  { %v915_v49 = vpop.f32.mrf.mxu1  ;;  %1391 = vmatmul.mubr.bf16.gmra.mxu0 %v1042_v48 }
 0x234   :  { %v916_v16 = vadd.f32 %v915_v49, %v2873_v7  ;;  %v1004_v44 = vmax.f32 %v914_v23, 0.0 }
 0x235   :  { %v919_v11 = vpop.f32.mrf.mxu1 }
 0x236   :  { %v1005_v59 = vmax.f32 %v916_v16, 0.0  ;;  %v1044_v9 = vpack.c.bf16 %v1004_v44, %v1002_v34  ;;  %v920_v36 = vadd.f32 %v919_v11, %v2876_v2 }
 0x237   :  { %v921_v31 = vpop.f32.mrf.mxu1 }
 0x238   :  { %v1045_v58 = vpack.c.bf16 %v1005_v59, %v1003_v1  ;;  %v922_v35 = vadd.f32 %v921_v31, %v2873_v7  ;;  %v1006_v19 = vmax.f32 %v920_v36, 0.0 }
 0x239   :  { %v923_v47 = vpop.f32.mrf.mxu1 }
 0x23a   :  { %v924_v12 = vadd.f32 %v923_v47, %v2876_v2  ;;  %1400 = vmatprep.mubr.bf16.mxu0 %v1045_v58  ;;  %v1007_v15 = vmax.f32 %v922_v35, 0.0 }
 0x23b   :  { %v925_v32 = vpop.f32.mrf.mxu1  ;;  %1401 = vmatmul.mubr.bf16.gmra.mxu0 %v1044_v9 }
 0x23c   :  { %v926_v57 = vadd.f32 %v925_v32, %v2873_v7  ;;  %v1008_v6 = vmax.f32 %v924_v12, 0.0 }
 0x23d   :  { %v929_v63 = vpop.f32.mrf.mxu1 }
 0x23e   :  { %v1009_v50 = vmax.f32 %v926_v57, 0.0  ;;  %v1046_v10 = vpack.c.bf16 %v1008_v6, %v1006_v19  ;;  %v930_v62 = vadd.f32 %v929_v63, %v2876_v2 }
 0x23f   :  { %v931_v8 = vpop.f32.mrf.mxu1 }
 0x240   :  { %v1047_v30 = vpack.c.bf16 %v1009_v50, %v1007_v15  ;;  %v932_v37 = vadd.f32 %v931_v8, %v2873_v7  ;;  %v1010_v22 = vmax.f32 %v930_v62, 0.0 }
 0x241   :  { %v933_v13 = vpop.f32.mrf.mxu1 }
 0x242   :  { %v934_v46 = vadd.f32 %v933_v13, %v2876_v2  ;;  %1410 = vmatprep.mubr.bf16.mxu0 %v1047_v30  ;;  %v1011_v51 = vmax.f32 %v932_v37, 0.0 }
 0x243   :  { %v935_v45 = vpop.f32.mrf.mxu1  ;;  %1411 = vmatmul.mubr.bf16.gmra.mxu0 %v1046_v10 }
 0x244   :  { %v936_v26 = vadd.f32 %v935_v45, %v2873_v7  ;;  %v1012_v5 = vmax.f32 %v934_v46, 0.0  ;;  %v1086_v46 = vld [vmem:[%s3541_s8] sm:$0x3] }
 0x245   :  { %v939_v29 = vpop.f32.mrf.mxu1  ;;  %v2946_v62 = vrot.slane %v1086_v46, %v2485_v14 }
 0x246   :  { %v1013_v48 = vmax.f32 %v936_v26, 0.0  ;;  %v1048_v54 = vpack.c.bf16 %v1012_v5, %v1010_v22  ;;  %v940_v11 = vadd.f32 %v939_v29, %v2876_v2 }
 0x247   :  { %v941_v33 = vpop.f32.mrf.mxu1 }
 0x248   :  { %v1049_v23 = vpack.c.bf16 %v1013_v48, %v1011_v51  ;;  %v942_v16 = vadd.f32 %v941_v33, %v2873_v7  ;;  %v1014_v47 = vmax.f32 %v940_v11, 0.0  ;;  %v2280_v48 = vld [vmem:[%s3533_s0] sm:$0x1] }
 0x249   :  { %v943_v49 = vpop.f32.mrf.mxu1  ;;  %v1483_v22 = vsub.f32 1.0, %v2280_v48 }
 0x24a   :  { %v944_v44 = vadd.f32 %v943_v49, %v2876_v2  ;;  %1420 = vmatprep.mubr.bf16.mxu0 %v1049_v23  ;;  %v1015_v58 = vmax.f32 %v942_v16, 0.0 }
 0x24b   :  { %v945_v1 = vpop.f32.mrf.mxu1  ;;  %1421 = vmatmul.mubr.bf16.gmra.mxu0 %v1048_v54  ;;  %v2959_v49 = vrot.slane %v1483_v22, %v2485_v14 }
 0x24c   :  { %v946_v59 = vadd.f32 %v945_v1, %v2873_v7  ;;  %v1016_v34 = vmax.f32 %v944_v44, 0.0 }
 0x24d   :  { %v949_v31 = vpop.f32.mrf.mxu1 }
 0x24e   :  { %v1017_v9 = vmax.f32 %v946_v59, 0.0  ;;  %v1050_v36 = vpack.c.bf16 %v1016_v34, %v1014_v47  ;;  %v950_v63 = vadd.f32 %v949_v31, %v2876_v2 }
 0x24f   :  { %v951_v35 = vpop.f32.mrf.mxu1 }
 0x250   :  { %v1051_v12 = vpack.c.bf16 %v1017_v9, %v1015_v58  ;;  %v952_v57 = vadd.f32 %v951_v35, %v2873_v7  ;;  %v1018_v10 = vmax.f32 %v950_v63, 0.0 }
 0x251   :  { %v953_v32 = vpop.f32.mrf.mxu1 }
 0x252   :  { %v954_v6 = vadd.f32 %v953_v32, %v2876_v2  ;;  %1430 = vmatprep.mubr.bf16.mxu0 %v1051_v12  ;;  %v1019_v8 = vmax.f32 %v952_v57, 0.0 }
 0x253   :  { %v955_v15 = vpop.f32.mrf.mxu1  ;;  %1431 = vmatmul.mubr.bf16.gmra.mxu0 %v1050_v36 }
 0x254   :  { %v956_v50 = vadd.f32 %v955_v15, %v2873_v7  ;;  %v1020_v19 = vmax.f32 %v954_v6, 0.0 }
 0x256   :  { %v1021_v30 = vmax.f32 %v956_v50, 0.0  ;;  %v1052_v37 = vpack.c.bf16 %v1020_v19, %v1018_v10 }
 0x258   :  { %v1053_v13 = vpack.c.bf16 %v1021_v30, %v1019_v8  ;;  %v2977_v30 = vrot.slane %v1086_v46, %v2731_v0  ;;  %v2281_v0 = vld [vmem:[%s3534_s1] sm:$0xff] }
 0x25a   :  { %1440 = vmatprep.mubr.bf16.mxu0 %v1053_v13 }
 0x25b   :  { %1441 = vmatmul.mubr.bf16.gmra.mxu0 %v1052_v37 }
 0x2a3   :  { %v1292_v2 = vpop.f32.mrf.mxu0 }
 0x2a4   :  { %v1293_v45 = vadd.f32 %v1292_v2, %v2946_v62 }
 0x2a5   :  { %v1294_v26 = vpop.f32.mrf.mxu0 }
 0x2a6   :  { %2152 = vtanh.f32 %v1293_v45 }
 0x2a7   :  { %v1296_v7 = vpop.f32.mrf.mxu0 }
 0x2a8   :  { %v1297_v5 = vadd.f32 %v1296_v7, %v2946_v62 }
 0x2a9   :  { %v2950_v29 = vpop.f32.mrf.mxu0 }
 0x2aa   :  { %2154 = vtanh.f32 %v1297_v5 }
 0x2ab   :  { %v1302_v51 = vpop.f32.mrf.mxu0 }
 0x2ac   :  { %v1303_v33 = vadd.f32 %v1302_v51, %v2946_v62  ;;  %v1295_v51 = vadd.f32 %v1294_v26, %v2977_v30 }
 0x2ad   :  { %v2956_v23 = vpop.f32.mrf.mxu0 }
 0x2ae   :  { %2156 = vtanh.f32 %v1303_v33 }
 0x2af   :  { %v1306_v54 = vpop.f32.mrf.mxu0 }
 0x2b0   :  { %v1307_v16 = vadd.f32 %v1306_v54, %v2946_v62 }
 0x2b1   :  { %v2962_v44 = vpop.f32.mrf.mxu0 }
 0x2b2   :  { %2158 = vtanh.f32 %v1307_v16 }
 0x2b3   :  { %v2153_v11 = vpop.eup %2152  ;;  %v1312_v1 = vpop.f32.mrf.mxu0 }
 0x2b4   :  { %v1484_v59 = vmul.f32 1.442695, %v2153_v11  ;;  %v1313_v34 = vadd.f32 %v1312_v1, %v2946_v62  ;;  %v1746_v31 = vmul.f32 %v2153_v11, %v2959_v49 }
 0x2b5   :  { %v2966_v58 = vpop.f32.mrf.mxu0 }
 0x2b6   :  { %2160 = vpow2.f32 %v1484_v59  ;;  %1778 = vadd.xlane.f32.xlu0 %v1746_v31  ;;  %v2282_v31 = vld [vmem:[%s3534_s1 + $0x8] sm:$0xff] }
 0x2b7   :  { %v2155_v9 = vpop.eup %2154  ;;  %2162 = vtanh.f32 %v1313_v34  ;;  %v1316_v14 = vpop.f32.mrf.mxu0  ;;  %v1299_v34 = vadd.f32 %v2950_v29, %v2977_v30 }
 0x2b8   :  { %v1486_v47 = vmul.f32 1.442695, %v2155_v9  ;;  %v1317_v35 = vadd.f32 %v1316_v14, %v2946_v62  ;;  %v1747_v12 = vmul.f32 %v2155_v9, %v2959_v49 }
 0x2b9   :  { %v2970_v36 = vpop.f32.mrf.mxu0 }
 0x2ba   :  { %2164 = vpow2.f32 %v1486_v47  ;;  %1780 = vadd.xlane.f32.xlu0 %v1747_v12 }
 0x2bb   :  { %v2157_v32 = vpop.eup %2156  ;;  %2166 = vtanh.f32 %v1317_v35  ;;  %v1322_v57 = vpop.f32.mrf.mxu0 }
 0x2bc   :  { %v1488_v6 = vmul.f32 1.442695, %v2157_v32  ;;  %v1323_v63 = vadd.f32 %v1322_v57, %v2946_v62  ;;  %v1748_v15 = vmul.f32 %v2157_v32, %v2959_v49 }
 0x2bd   :  { %v2974_v50 = vpop.f32.mrf.mxu0 }
 0x2be   :  { %2168 = vpow2.f32 %v1488_v6  ;;  %1782 = vadd.xlane.f32.xlu1 %v1748_v15 }
 0x2bf   :  { %v2159_v19 = vpop.eup %2158  ;;  %2170 = vtanh.f32 %v1323_v63  ;;  %v1326_v8 = vpop.f32.mrf.mxu0 }
 0x2c0   :  { %v1490_v10 = vmul.f32 1.442695, %v2159_v19  ;;  %v1327_v13 = vadd.f32 %v1326_v8, %v2946_v62  ;;  %v1749_v37 = vmul.f32 %v2159_v19, %v2959_v49  ;;  %v1305_v19 = vadd.f32 %v2956_v23, %v2977_v30  ;;  %v2283_v8 = vld [vmem:[%s3534_s1 + $0x10] sm:$0xff] }
 0x2c1   :  { %v2981_v2 = vpop.f32.mrf.mxu0 }
 0x2c2   :  { %2172 = vpow2.f32 %v1490_v10  ;;  %1784 = vadd.xlane.f32.xlu1 %v1749_v37 }
 0x2c3   :  { %v2161_v45 = vpop.eup %2160  ;;  %2174 = vtanh.f32 %v1327_v13  ;;  %v1332_v7 = vpop.f32.mrf.mxu0 }
 0x2c4   :  { %v2163_v5 = vpop.eup %2162  ;;  %v1548_v46 = vmul.f32 %v2281_v0, %v2161_v45  ;;  %v1333_v48 = vadd.f32 %v1332_v7, %v2946_v62 }
 0x2c5   :  { %v1492_v22 = vmul.f32 1.442695, %v2163_v5  ;;  %v2988_v33 = vpop.f32.mrf.mxu0  ;;  %v1750_v54 = vmul.f32 %v2163_v5, %v2959_v49 }
 0x2c6   :  { %v1580_v16 = vadd.f32 %v1548_v46, %v1295_v51  ;;  %2176 = vtanh.f32 %v1333_v48  ;;  %v1309_v48 = vadd.f32 %v2962_v44, %v2977_v30 }
 0x2c7   :  { %v2165_v11 = vpop.eup %2164  ;;  %2178 = vpow2.f32 %v1492_v22  ;;  %1786 = vadd.xlane.f32.xlu0 %v1750_v54  ;;  %v1336_v1 = vpop.f32.mrf.mxu0  ;;  %v2284_v22 = vld [vmem:[%s3534_s1 + $0x18] sm:$0xff] }
 0x2c8   :  { %v2167_v59 = vpop.eup %2166  ;;  %v1618_v26 = vmul.f32 %v2959_v49, %v1580_v16  ;;  %v1549_v9 = vmul.f32 %v2282_v31, %v2165_v11  ;;  %v1337_v14 = vadd.f32 %v1336_v1, %v2946_v62 }
 0x2c9   :  { %v1494_v47 = vmul.f32 1.442695, %v2167_v59  ;;  %v2998_v35 = vpop.f32.mrf.mxu0  ;;  %v1751_v12 = vmul.f32 %v2167_v59, %v2959_v49 }
 0x2ca   :  { %v1650_v32 = vadd.f32 %v1618_v26, %v2505_v24  ;;  %v1581_v57 = vadd.f32 %v1549_v9, %v1299_v34  ;;  %2180 = vtanh.f32 %v1337_v14 }
 0x2cb   :  { %v2169_v6 = vpop.eup %2168  ;;  %2182 = vpow2.f32 %v1494_v47  ;;  %1788 = vadd.xlane.f32.xlu1 %v1751_v12  ;;  %v1342_v29 = vpop.f32.mrf.mxu0 }
 0x2cc   :  { %v2171_v63 = vpop.eup %2170  ;;  %1682 = vst [vmem:[#allocation8] sm:$0xff] %v1650_v32  ;;  %v1619_v15 = vmul.f32 %v2959_v49, %v1581_v57  ;;  %v1550_v10 = vmul.f32 %v2283_v8, %v2169_v6  ;;  %v1343_v24 = vadd.f32 %v1342_v29, %v2946_v62  ;;  %v1315_v32 = vadd.f32 %v2966_v58, %v2977_v30 }
 0x2cd   :  { %v1496_v13 = vmul.f32 1.442695, %v2171_v63  ;;  %v3009_v37 = vpop.f32.mrf.mxu0  ;;  %v1752_v45 = vmul.f32 %v2171_v63, %v2959_v49 }
 0x2ce   :  { %v1651_v7 = vadd.f32 %v1619_v15, %v2508_v25  ;;  %v1582_v5 = vadd.f32 %v1550_v10, %v1305_v19  ;;  %2184 = vtanh.f32 %v1343_v24 }
 0x2cf   :  { %v2173_v51 = vpop.eup %2172  ;;  %2186 = vpow2.f32 %v1496_v13  ;;  %1790 = vadd.xlane.f32.xlu0 %v1752_v45  ;;  %v1346_v23 = vpop.f32.mrf.mxu0  ;;  %v1319_v45 = vadd.f32 %v2970_v36, %v2977_v30 }
 0x2d0   :  { %v2175_v0 = vpop.eup %2174  ;;  %1683 = vst [vmem:[#allocation8 + $0x8] sm:$0xff] %v1651_v7  ;;  %v1620_v46 = vmul.f32 %v2959_v49, %v1582_v5  ;;  %v1551_v54 = vmul.f32 %v2284_v22, %v2173_v51  ;;  %v1347_v25 = vadd.f32 %v1346_v23, %v2946_v62 }
 0x2d1   :  { %v1498_v16 = vmul.f32 1.442695, %v2175_v0  ;;  %v3020_v11 = vpop.f32.mrf.mxu0  ;;  %v1753_v1 = vmul.f32 %v2175_v0, %v2959_v49 }
 0x2d2   :  { %v1652_v59 = vadd.f32 %v1620_v46, %v2533_v38  ;;  %v1583_v26 = vadd.f32 %v1551_v54, %v1309_v48  ;;  %2188 = vtanh.f32 %v1347_v25  ;;  %v2285_v38 = vld [vmem:[%s3534_s1 + $0x20] sm:$0xff] }
 0x2d3   :  { %v2177_v34 = vpop.eup %2176  ;;  %2190 = vpow2.f32 %v1498_v16  ;;  %1792 = vadd.xlane.f32.xlu1 %v1753_v1  ;;  %v1352_v44 = vpop.f32.mrf.mxu0  ;;  %v1325_v16 = vadd.f32 %v2974_v50, %v2977_v30  ;;  %v2287_v1 = vld [vmem:[%s3534_s1 + $0x30] sm:$0xff] }
 0x2d4   :  { %v2179_v31 = vpop.eup %2178  ;;  %1684 = vst [vmem:[#allocation8 + $0x10] sm:$0xff] %v1652_v59  ;;  %v1621_v9 = vmul.f32 %v2959_v49, %v1583_v26  ;;  %v1500_v14 = vmul.f32 1.442695, %v2177_v34  ;;  %v1353_v47 = vadd.f32 %v1352_v44, %v2946_v62  ;;  %v1754_v12 = vmul.f32 %v2177_v34, %v2959_v49 }
 0x2d5   :  { %v1552_v57 = vmul.f32 %v2285_v38, %v2179_v31  ;;  %v3032_v6 = vpop.f32.mrf.mxu0  ;;  %v2288_v38 = vld [vmem:[%s3534_s1 + $0x38] sm:$0xff] }
 0x2d6   :  { %v1653_v29 = vadd.f32 %v1621_v9, %v2536_v39  ;;  %2192 = vpow2.f32 %v1500_v14  ;;  %1794 = vadd.xlane.f32.xlu0 %v1754_v12  ;;  %v2286_v39 = vld [vmem:[%s3534_s1 + $0x28] sm:$0xff] }
 0x2d7   :  { %v2181_v63 = vpop.eup %2180  ;;  %v1584_v15 = vadd.f32 %v1552_v57, %v1315_v32  ;;  %2194 = vtanh.f32 %v1353_v47  ;;  %v1356_v19 = vpop.f32.mrf.mxu0  ;;  %v1329_v32 = vadd.f32 %v2981_v2, %v2977_v30  ;;  %v2289_v2 = vld [vmem:[%s3534_s1 + $0x40] sm:$0xff] }
 0x2d8   :  { %v2183_v8 = vpop.eup %2182  ;;  %1685 = vst [vmem:[#allocation8 + $0x18] sm:$0xff] %v1653_v29  ;;  %v1502_v10 = vmul.f32 1.442695, %v2181_v63  ;;  %v1357_v58 = vadd.f32 %v1356_v19, %v2946_v62  ;;  %v1755_v24 = vmul.f32 %v2181_v63, %v2959_v49 }
 0x2d9   :  { %v1622_v13 = vmul.f32 %v2959_v49, %v1584_v15  ;;  %v1553_v7 = vmul.f32 %v2286_v39, %v2183_v8  ;;  %v3043_v5 = vpop.f32.mrf.mxu0 }
 0x2da   :  { %2196 = vpow2.f32 %v1502_v10  ;;  %1796 = vadd.xlane.f32.xlu1 %v1755_v24  ;;  %v1335_v10 = vadd.f32 %v2988_v33, %v2977_v30 }
 0x2db   :  { %v2185_v51 = vpop.eup %2184  ;;  %v1654_v23 = vadd.f32 %v1622_v13, %v2563_v52  ;;  %v1585_v0 = vadd.f32 %v1553_v7, %v1319_v45  ;;  %2198 = vtanh.f32 %v1357_v58  ;;  %v1362_v46 = vpop.f32.mrf.mxu0 }
 0x2dc   :  { %v2187_v48 = vpop.eup %2186  ;;  %v1504_v22 = vmul.f32 1.442695, %v2185_v51  ;;  %v1363_v54 = vadd.f32 %v1362_v46, %v2946_v62  ;;  %v1756_v36 = vmul.f32 %v2185_v51, %v2959_v49 }
 0x2dd   :  { %1686 = vst [vmem:[#allocation8 + $0x20] sm:$0xff] %v1654_v23  ;;  %v1623_v25 = vmul.f32 %v2959_v49, %v1585_v0  ;;  %v1554_v52 = vmul.f32 %v2287_v1, %v2187_v48  ;;  %v3054_v59 = vpop.f32.mrf.mxu0  ;;  %v1339_v48 = vadd.f32 %v2998_v35, %v2977_v30 }
 0x2de   :  { %2200 = vpow2.f32 %v1504_v22  ;;  %1798 = vadd.xlane.f32.xlu0 %v1756_v36  ;;  %v2290_v22 = vld [vmem:[%s3534_s1 + $0x48] sm:$0xff] }
 0x2df   :  { %v2189_v26 = vpop.eup %2188  ;;  %v1655_v34 = vadd.f32 %v1623_v25, %v2566_v53  ;;  %v1586_v44 = vadd.f32 %v1554_v52, %v1325_v16  ;;  %2202 = vtanh.f32 %v1363_v54  ;;  %v1366_v31 = vpop.f32.mrf.mxu0 }
 0x2e0   :  { %v2191_v9 = vpop.eup %2190  ;;  %v1506_v14 = vmul.f32 1.442695, %v2189_v26  ;;  %v1367_v47 = vadd.f32 %v1366_v31, %v2946_v62  ;;  %v1757_v50 = vmul.f32 %v2189_v26, %v2959_v49  ;;  %v1345_v31 = vadd.f32 %v3009_v37, %v2977_v30 }
 0x2e1   :  { %1687 = vst [vmem:[#allocation8 + $0x28] sm:$0xff] %v1655_v34  ;;  %v1624_v12 = vmul.f32 %v2959_v49, %v1586_v44  ;;  %v1555_v53 = vmul.f32 %v2288_v38, %v2191_v9  ;;  %v3065_v57 = vpop.f32.mrf.mxu0  ;;  %v2291_v9 = vld [vmem:[%s3534_s1 + $0x50] sm:$0xff] }
 0x2e2   :  { %2204 = vpow2.f32 %v1506_v14  ;;  %1800 = vadd.xlane.f32.xlu1 %v1757_v50 }
 0x2e3   :  { %v2193_v29 = vpop.eup %2192  ;;  %v1656_v63 = vadd.f32 %v1624_v12, %v2593_v3  ;;  %v1587_v15 = vadd.f32 %v1555_v53, %v1329_v32  ;;  %2206 = vtanh.f32 %v1367_v47  ;;  %v1372_v19 = vpop.f32.mrf.mxu0 }
 0x2e4   :  { %v2195_v8 = vpop.eup %2194  ;;  %v1556_v58 = vmul.f32 %v2289_v2, %v2193_v29  ;;  %v1373_v24 = vadd.f32 %v1372_v19, %v2946_v62  ;;  %v2292_v19 = vld [vmem:[%s3534_s1 + $0x58] sm:$0xff] }
 0x2e5   :  { %1688 = vst [vmem:[#allocation8 + $0x30] sm:$0xff] %v1656_v63  ;;  %v1625_v13 = vmul.f32 %v2959_v49, %v1587_v15  ;;  %v1508_v45 = vmul.f32 1.442695, %v2195_v8  ;;  %v3075_v39 = vpop.f32.mrf.mxu0  ;;  %v1758_v3 = vmul.f32 %v2195_v8, %v2959_v49  ;;  %v1349_v15 = vadd.f32 %v3020_v11, %v2977_v30 }
 0x2e6   :  { %v1588_v7 = vadd.f32 %v1556_v58, %v1335_v10  ;;  %2208 = vtanh.f32 %v1373_v24 }
 0x2e7   :  { %v2197_v51 = vpop.eup %2196  ;;  %v1657_v33 = vadd.f32 %v1625_v13, %v2596_v4  ;;  %2210 = vpow2.f32 %v1508_v45  ;;  %1802 = vadd.xlane.f32.xlu0 %v1758_v3  ;;  %v1376_v23 = vpop.f32.mrf.mxu0 }
 0x2e8   :  { %v2199_v0 = vpop.eup %2198  ;;  %v1626_v46 = vmul.f32 %v2959_v49, %v1588_v7  ;;  %v1557_v54 = vmul.f32 %v2290_v22, %v2197_v51  ;;  %v1377_v36 = vadd.f32 %v1376_v23, %v2946_v62 }
 0x2e9   :  { %1689 = vst [vmem:[#allocation8 + $0x38] sm:$0xff] %v1657_v33  ;;  %v1510_v25 = vmul.f32 1.442695, %v2199_v0  ;;  %v3086_v16 = vpop.f32.mrf.mxu0  ;;  %v1759_v4 = vmul.f32 %v2199_v0, %v2959_v49  ;;  %v1355_v0 = vadd.f32 %v3032_v6, %v2977_v30 }
 0x2ea   :  { %v1658_v1 = vadd.f32 %v1626_v46, %v2623_v20  ;;  %v1589_v52 = vadd.f32 %v1557_v54, %v1339_v48  ;;  %2212 = vtanh.f32 %v1377_v36 }
 0x2eb   :  { %v2201_v26 = vpop.eup %2200  ;;  %2214 = vpow2.f32 %v1510_v25  ;;  %1804 = vadd.xlane.f32.xlu1 %v1759_v4  ;;  %v1382_v35 = vpop.f32.mrf.mxu0 }
 0x2ec   :  { %v2203_v34 = vpop.eup %2202  ;;  %1690 = vst [vmem:[#allocation8 + $0x40] sm:$0xff] %v1658_v1  ;;  %v1627_v44 = vmul.f32 %v2959_v49, %v1589_v52  ;;  %v1558_v14 = vmul.f32 %v2291_v9, %v2201_v26  ;;  %v1383_v20 = vadd.f32 %v1382_v35, %v2946_v62  ;;  %v1359_v35 = vadd.f32 %v3043_v5, %v2977_v30 }
 0x2ed   :  { %v1512_v47 = vmul.f32 1.442695, %v2203_v34  ;;  %v3097_v50 = vpop.f32.mrf.mxu0  ;;  %v1760_v12 = vmul.f32 %v2203_v34, %v2959_v49 }
 0x2ee   :  { %v1659_v32 = vadd.f32 %v1627_v44, %v2626_v21  ;;  %v1590_v38 = vadd.f32 %v1558_v14, %v1345_v31  ;;  %2216 = vtanh.f32 %v1383_v20 }
 0x2ef   :  { %v2205_v53 = vpop.eup %2204  ;;  %2218 = vpow2.f32 %v1512_v47  ;;  %1806 = vadd.xlane.f32.xlu0 %v1760_v12  ;;  %v1386_v37 = vpop.f32.mrf.mxu0 }
 0x2f0   :  { %v2207_v29 = vpop.eup %2206  ;;  %1691 = vst [vmem:[#allocation8 + $0x48] sm:$0xff] %v1659_v32  ;;  %v1628_v63 = vmul.f32 %v2959_v49, %v1590_v38  ;;  %v1559_v8 = vmul.f32 %v2292_v19, %v2205_v53  ;;  %v1387_v21 = vadd.f32 %v1386_v37, %v2946_v62  ;;  %v1365_v53 = vadd.f32 %v3054_v59, %v2977_v30  ;;  %v2295_v37 = vld [vmem:[%s3534_s1 + $0x70] sm:$0xff] }
 0x2f1   :  { %v1514_v10 = vmul.f32 1.442695, %v2207_v29  ;;  %v3108_v2 = vpop.f32.mrf.mxu0  ;;  %v1761_v58 = vmul.f32 %v2207_v29, %v2959_v49 }
 0x2f2   :  { %v1660_v24 = vadd.f32 %v1628_v63, %v2653_v42  ;;  %v1591_v13 = vadd.f32 %v1559_v8, %v1349_v15  ;;  %2220 = vtanh.f32 %v1387_v21  ;;  %v2293_v42 = vld [vmem:[%s3534_s1 + $0x60] sm:$0xff] }
 0x2f3   :  { %v2209_v45 = vpop.eup %2208  ;;  %2222 = vpow2.f32 %v1514_v10  ;;  %1808 = vadd.xlane.f32.xlu1 %v1761_v58  ;;  %v1392_v11 = vpop.f32.mrf.mxu0 }
 0x2f4   :  { %v2211_v3 = vpop.eup %2210  ;;  %1692 = vst [vmem:[#allocation8 + $0x50] sm:$0xff] %v1660_v24  ;;  %v1629_v7 = vmul.f32 %v2959_v49, %v1591_v13  ;;  %v1516_v51 = vmul.f32 1.442695, %v2209_v45  ;;  %v1393_v33 = vadd.f32 %v1392_v11, %v2946_v62  ;;  %v1762_v23 = vmul.f32 %v2209_v45, %v2959_v49  ;;  %v2296_v45 = vld [vmem:[%s3534_s1 + $0x78] sm:$0xff] }
 0x2f5   :  { %v1560_v46 = vmul.f32 %v2293_v42, %v2211_v3  ;;  %v3120_v48 = vpop.f32.mrf.mxu0  ;;  %v1369_v13 = vadd.f32 %v3065_v57, %v2977_v30  ;;  %v2297_v57 = vld [vmem:[%s3534_s1 + $0x80] sm:$0xff] }
 0x2f6   :  { %v1661_v22 = vadd.f32 %v1629_v7, %v2656_v43  ;;  %2224 = vpow2.f32 %v1516_v51  ;;  %1810 = vadd.xlane.f32.xlu0 %v1762_v23  ;;  %v2294_v43 = vld [vmem:[%s3534_s1 + $0x68] sm:$0xff] }
 0x2f7   :  { %v2213_v54 = vpop.eup %2212  ;;  %v1592_v36 = vadd.f32 %v1560_v46, %v1355_v0  ;;  %2226 = vtanh.f32 %v1393_v33  ;;  %v1396_v25 = vpop.f32.mrf.mxu0  ;;  %v1375_v0 = vadd.f32 %v3075_v39, %v2977_v30 }
 0x2f8   :  { %v2215_v4 = vpop.eup %2214  ;;  %1693 = vst [vmem:[#allocation8 + $0x58] sm:$0xff] %v1661_v22  ;;  %v1518_v1 = vmul.f32 1.442695, %v2213_v54  ;;  %v1397_v6 = vadd.f32 %v1396_v25, %v2946_v62  ;;  %v1763_v52 = vmul.f32 %v2213_v54, %v2959_v49 }
 0x2f9   :  { %v1630_v26 = vmul.f32 %v2959_v49, %v1592_v36  ;;  %v1561_v34 = vmul.f32 %v2294_v43, %v2215_v4  ;;  %v3131_v44 = vpop.f32.mrf.mxu0 }
 0x2fa   :  { %2228 = vpow2.f32 %v1518_v1  ;;  %1812 = vadd.xlane.f32.xlu1 %v1763_v52 }
 0x2fb   :  { %v2217_v31 = vpop.eup %2216  ;;  %v1662_v9 = vadd.f32 %v1630_v26, %v2683_v60  ;;  %v1593_v14 = vadd.f32 %v1561_v34, %v1359_v35  ;;  %2230 = vtanh.f32 %v1397_v6  ;;  %v1402_v20 = vpop.f32.mrf.mxu0  ;;  %v1379_v26 = vadd.f32 %v3086_v16, %v2977_v30  ;;  %v2298_v35 = vld [vmem:[%s3534_s1 + $0x88] sm:$0xff] }
 0x2fc   :  { %v2219_v47 = vpop.eup %2218  ;;  %v1520_v12 = vmul.f32 1.442695, %v2217_v31  ;;  %v1403_v32 = vadd.f32 %v1402_v20, %v2946_v62  ;;  %v1764_v5 = vmul.f32 %v2217_v31, %v2959_v49 }
 0x2fd   :  { %1694 = vst [vmem:[#allocation8 + $0x60] sm:$0xff] %v1662_v9  ;;  %v1631_v38 = vmul.f32 %v2959_v49, %v1593_v14  ;;  %v1562_v60 = vmul.f32 %v2295_v37, %v2219_v47  ;;  %v3142_v29 = vpop.f32.mrf.mxu0 }
 0x2fe   :  { %2232 = vpow2.f32 %v1520_v12  ;;  %1814 = vadd.xlane.f32.xlu0 %v1764_v5  ;;  %v1385_v5 = vadd.f32 %v3097_v50, %v2977_v30 }
 0x2ff   :  { %v2221_v63 = vpop.eup %2220  ;;  %v1663_v15 = vadd.f32 %v1631_v38, %v2686_v61  ;;  %v1594_v19 = vadd.f32 %v1562_v60, %v1365_v53  ;;  %2234 = vtanh.f32 %v1403_v32  ;;  %v1406_v8 = vpop.f32.mrf.mxu0  ;;  %v2299_v38 = vld [vmem:[%s3534_s1 + $0x90] sm:$0xff] }
 0x300   :  { %v2223_v21 = vpop.eup %2222  ;;  %v1522_v10 = vmul.f32 1.442695, %v2221_v63  ;;  %v1407_v58 = vadd.f32 %v1406_v8, %v2946_v62  ;;  %v1765_v59 = vmul.f32 %v2221_v63, %v2959_v49 }
 0x301   :  { %1695 = vst [vmem:[#allocation8 + $0x68] sm:$0xff] %v1663_v15  ;;  %v1632_v24 = vmul.f32 %v2959_v49, %v1594_v19  ;;  %v1563_v61 = vmul.f32 %v2296_v45, %v2223_v21  ;;  %v3153_v11 = vpop.f32.mrf.mxu0 }
 0x302   :  { %2236 = vpow2.f32 %v1522_v10  ;;  %1816 = vadd.xlane.f32.xlu1 %v1765_v59  ;;  %v2300_v59 = vld [vmem:[%s3534_s1 + $0x98] sm:$0xff] }
 0x303   :  { %v2225_v3 = vpop.eup %2224  ;;  %v1664_v7 = vadd.f32 %v1632_v24, %v2713_v17  ;;  %v1595_v51 = vadd.f32 %v1563_v61, %v1369_v13  ;;  %2238 = vtanh.f32 %v1407_v58  ;;  %v1412_v33 = vpop.f32.mrf.mxu0  ;;  %v1389_v58 = vadd.f32 %v3108_v2, %v2977_v30 }
 0x304   :  { %v2227_v23 = vpop.eup %2226  ;;  %v1564_v42 = vmul.f32 %v2297_v57, %v2225_v3  ;;  %v1413_v46 = vadd.f32 %v1412_v33, %v2946_v62 }
 0x305   :  { %1696 = vst [vmem:[#allocation8 + $0x70] sm:$0xff] %v1664_v7  ;;  %v1633_v22 = vmul.f32 %v2959_v49, %v1595_v51  ;;  %v1524_v54 = vmul.f32 1.442695, %v2227_v23  ;;  %v3163_v36 = vpop.f32.mrf.mxu0  ;;  %v1766_v17 = vmul.f32 %v2227_v23, %v2959_v49 }
 0x306   :  { %v1596_v25 = vadd.f32 %v1564_v42, %v1375_v0  ;;  %2240 = vtanh.f32 %v1413_v46  ;;  %v1395_v46 = vadd.f32 %v3120_v48, %v2977_v30 }
 0x307   :  { %v2229_v4 = vpop.eup %2228  ;;  %v1665_v39 = vadd.f32 %v1633_v22, %v2716_v18  ;;  %2242 = vpow2.f32 %v1524_v54  ;;  %1818 = vadd.xlane.f32.xlu0 %v1766_v17  ;;  %v1416_v1 = vpop.f32.mrf.mxu0 }
 0x308   :  { %v2231_v6 = vpop.eup %2230  ;;  %v1634_v52 = vmul.f32 %v2959_v49, %v1596_v25  ;;  %v1565_v43 = vmul.f32 %v2298_v35, %v2229_v4  ;;  %v1417_v34 = vadd.f32 %v1416_v1, %v2946_v62  ;;  %v1399_v35 = vadd.f32 %v3131_v44, %v2977_v30 }
 0x309   :  { %1697 = vst [vmem:[#allocation8 + $0x78] sm:$0xff] %v1665_v39  ;;  %v1526_v31 = vmul.f32 1.442695, %v2231_v6  ;;  %v3174_v9 = vpop.f32.mrf.mxu0  ;;  %v1767_v18 = vmul.f32 %v2231_v6, %v2959_v49 }
 0x30a   :  { %v1666_v14 = vadd.f32 %v1634_v52, %v2511_v27  ;;  %v1597_v20 = vadd.f32 %v1565_v43, %v1379_v26  ;;  %2244 = vtanh.f32 %v1417_v34 }
 0x30b   :  { %v2233_v47 = vpop.eup %2232  ;;  %2246 = vpow2.f32 %v1526_v31  ;;  %1820 = vadd.xlane.f32.xlu1 %v1767_v18  ;;  %v1422_v16 = vpop.f32.mrf.mxu0 }
 0x30c   :  { %v2235_v12 = vpop.eup %2234  ;;  %1698 = vst [vmem:[#allocation8 + $0x80] sm:$0xff] %v1666_v14  ;;  %v1635_v32 = vmul.f32 %v2959_v49, %v1597_v20  ;;  %v1566_v53 = vmul.f32 %v2299_v38, %v2233_v47  ;;  %v1423_v27 = vadd.f32 %v1422_v16, %v2946_v62  ;;  %v2303_v38 = vld [vmem:[%s3534_s1 + $0xb0] sm:$0xff] }
 0x30d   :  { %v1528_v37 = vmul.f32 1.442695, %v2235_v12  ;;  %v3185_v60 = vpop.f32.mrf.mxu0  ;;  %v1768_v63 = vmul.f32 %v2235_v12, %v2959_v49 }
 0x30e   :  { %v1667_v15 = vadd.f32 %v1635_v32, %v2514_v28  ;;  %v1598_v19 = vadd.f32 %v1566_v53, %v1385_v5  ;;  %2248 = vtanh.f32 %v1423_v27  ;;  %v1405_v5 = vadd.f32 %v3142_v29, %v2977_v30 }
 0x30f   :  { %v2237_v8 = vpop.eup %2236  ;;  %2250 = vpow2.f32 %v1528_v37  ;;  %1822 = vadd.xlane.f32.xlu0 %v1768_v63  ;;  %v1426_v50 = vpop.f32.mrf.mxu0 }
 0x310   :  { %v2239_v21 = vpop.eup %2238  ;;  %1699 = vst [vmem:[#allocation8 + $0x88] sm:$0xff] %v1667_v15  ;;  %v1636_v10 = vmul.f32 %v2959_v49, %v1598_v19  ;;  %v1567_v24 = vmul.f32 %v2300_v59, %v2237_v8  ;;  %v1427_v28 = vadd.f32 %v1426_v50, %v2946_v62 }
 0x311   :  { %v1530_v13 = vmul.f32 1.442695, %v2239_v21  ;;  %v3196_v45 = vpop.f32.mrf.mxu0  ;;  %v1769_v61 = vmul.f32 %v2239_v21, %v2959_v49 }
 0x312   :  { %v1668_v3 = vadd.f32 %v1636_v10, %v2540_v40  ;;  %v1599_v7 = vadd.f32 %v1567_v24, %v1389_v58  ;;  %2252 = vtanh.f32 %v1427_v28  ;;  %v2301_v40 = vld [vmem:[%s3534_s1 + $0xa0] sm:$0xff]  ;;  %v1409_v10 = vadd.f32 %v3153_v11, %v2977_v30  ;;  %v2304_v58 = vld [vmem:[%s3534_s1 + $0xb8] sm:$0xff] }
 0x313   :  { %v2241_v51 = vpop.eup %2240  ;;  %2254 = vpow2.f32 %v1530_v13  ;;  %1824 = vadd.xlane.f32.xlu1 %v1769_v61  ;;  %v1432_v2 = vpop.f32.mrf.mxu0  ;;  %v3564_v24 = vld [vmem:[#allocation12_spill] sm:$0xff]  ;;  %v1415_v61 = vadd.f32 %v3163_v36, %v2977_v30 }
 0x314   :  { %v2243_v33 = vpop.eup %2242  ;;  %1700 = vst [vmem:[#allocation8 + $0x90] sm:$0xff] %v1668_v3  ;;  %v1637_v23 = vmul.f32 %v2959_v49, %v1599_v7  ;;  %v1532_v0 = vmul.f32 1.442695, %v2241_v51  ;;  %v1433_v57 = vadd.f32 %v1432_v2, %v2946_v62  ;;  %v1770_v42 = vmul.f32 %v2241_v51, %v2959_v49  ;;  %v2305_v11 = vld [vmem:[%s3534_s1 + $0xc0] sm:$0xff] }
 0x315   :  { %v1568_v22 = vmul.f32 %v2301_v40, %v2243_v33  ;;  %v3208_v54 = vpop.f32.mrf.mxu0  ;;  %v2306_v40 = vld [vmem:[%s3534_s1 + $0xc8] sm:$0xff] }
 0x316   :  { %v1669_v17 = vadd.f32 %v1637_v23, %v2543_v41  ;;  %2256 = vpow2.f32 %v1532_v0  ;;  %1826 = vadd.xlane.f32.xlu0 %v1770_v42  ;;  %v2302_v41 = vld [vmem:[%s3534_s1 + $0xa8] sm:$0xff] }
 0x317   :  { %v2245_v25 = vpop.eup %2244  ;;  %v1600_v4 = vadd.f32 %v1568_v22, %v1395_v46  ;;  %2258 = vtanh.f32 %v1433_v57  ;;  %v1436_v39 = vpop.f32.mrf.mxu0  ;;  %v3565_v0 = vld [vmem:[#allocation13_spill] sm:$0xff]  ;;  %v1419_v46 = vadd.f32 %v3174_v9, %v2977_v30  ;;  %v1425_v9 = vadd.f32 %v3185_v60, %v2977_v30 }
 0x318   :  { %v2247_v1 = vpop.eup %2246  ;;  %1701 = vst [vmem:[#allocation8 + $0x98] sm:$0xff] %v1669_v17  ;;  %v1534_v6 = vmul.f32 1.442695, %v2245_v25  ;;  %v1437_v48 = vadd.f32 %v1436_v39, %v2946_v62  ;;  %v1771_v52 = vmul.f32 %v2245_v25, %v2959_v49  ;;  %v1429_v60 = vadd.f32 %v3196_v45, %v2977_v30 }
 0x319   :  { %v1638_v26 = vmul.f32 %v2959_v49, %v1600_v4  ;;  %v1569_v43 = vmul.f32 %v2302_v41, %v2247_v1  ;;  %v3219_v34 = vpop.f32.mrf.mxu0  ;;  %v3566_v4 = vld [vmem:[#allocation14_spill] sm:$0xff]  ;;  %v1435_v45 = vadd.f32 %v3208_v54, %v2977_v30 }
 0x31a   :  { %2260 = vpow2.f32 %v1534_v6  ;;  %1828 = vadd.xlane.f32.xlu1 %v1771_v52 }
 0x31b   :  { %v2249_v31 = vpop.eup %2248  ;;  %v1670_v18 = vadd.f32 %v1638_v26, %v2570_v55  ;;  %v1601_v14 = vadd.f32 %v1569_v43, %v1399_v35  ;;  %2262 = vtanh.f32 %v1437_v48  ;;  %v1442_v20 = vpop.f32.mrf.mxu0  ;;  %v2307_v26 = vld [vmem:[%s3534_s1 + $0xd0] sm:$0xff] }
 0x31c   :  { %v2251_v47 = vpop.eup %2250  ;;  %v1536_v16 = vmul.f32 1.442695, %v2249_v31  ;;  %v1443_v12 = vadd.f32 %v1442_v20, %v2946_v62  ;;  %v1772_v44 = vmul.f32 %v2249_v31, %v2959_v49  ;;  %v3567_v31 = vld [vmem:[#allocation15_spill] sm:$0xff] }
 0x31d   :  { %1702 = vst [vmem:[#allocation8 + $0xa0] sm:$0xff] %v1670_v18  ;;  %v1639_v32 = vmul.f32 %v2959_v49, %v1601_v14  ;;  %v1570_v55 = vmul.f32 %v2303_v38, %v2251_v47  ;;  %v3230_v53 = vpop.f32.mrf.mxu0  ;;  %v3568_v38 = vld [vmem:[#allocation16_spill] sm:$0xff] }
 0x31e   :  { %2264 = vpow2.f32 %v1536_v16  ;;  %1830 = vadd.xlane.f32.xlu0 %v1772_v44 }
 0x31f   :  { %v2253_v27 = vpop.eup %2252  ;;  %v1671_v37 = vadd.f32 %v1639_v32, %v2573_v56  ;;  %v1602_v63 = vadd.f32 %v1570_v55, %v1405_v5  ;;  %2266 = vtanh.f32 %v1443_v12  ;;  %v1446_v15 = vpop.f32.mrf.mxu0  ;;  %v2308_v12 = vld [vmem:[%s3534_s1 + $0xd8] sm:$0xff] }
 0x320   :  { %v2255_v19 = vpop.eup %2254  ;;  %v1538_v8 = vmul.f32 1.442695, %v2253_v27  ;;  %v1447_v50 = vadd.f32 %v1446_v15, %v2946_v62  ;;  %v1773_v29 = vmul.f32 %v2253_v27, %v2959_v49  ;;  %v2309_v15 = vld [vmem:[%s3534_s1 + $0xe0] sm:$0xff] }
 0x321   :  { %1703 = vst [vmem:[#allocation8 + $0xa8] sm:$0xff] %v1671_v37  ;;  %v1640_v21 = vmul.f32 %v2959_v49, %v1602_v63  ;;  %v1571_v56 = vmul.f32 %v2304_v58, %v2255_v19  ;;  %v1439_v58 = vadd.f32 %v3219_v34, %v2977_v30 }
 0x322   :  { %2268 = vpow2.f32 %v1538_v8  ;;  %1832 = vadd.xlane.f32.xlu1 %v1773_v29  ;;  %v3569_v8 = vld [vmem:[#allocation17_spill] sm:$0xff] }
 0x323   :  { %v2257_v59 = vpop.eup %2256  ;;  %v1672_v28 = vadd.f32 %v1640_v21, %v3564_v24  ;;  %v1603_v13 = vadd.f32 %v1571_v56, %v1409_v10  ;;  %2270 = vtanh.f32 %v1447_v50  ;;  %v2310_v56 = vld [vmem:[%s3534_s1 + $0xe8] sm:$0xff] }
 0x324   :  { %v2259_v62 = vpop.eup %2258  ;;  %v1572_v3 = vmul.f32 %v2305_v11, %v2257_v59  ;;  %v3570_v59 = vld [vmem:[#allocation18_spill] sm:$0xff] }
 0x325   :  { %1704 = vst [vmem:[#allocation8 + $0xb0] sm:$0xff] %v1672_v28  ;;  %v1641_v7 = vmul.f32 %v2959_v49, %v1603_v13  ;;  %v1540_v51 = vmul.f32 1.442695, %v2259_v62  ;;  %v1774_v2 = vmul.f32 %v2259_v62, %v2959_v49  ;;  %v2311_v11 = vld [vmem:[%s3534_s1 + $0xf0] sm:$0xff] }
 0x326   :  { %v1604_v33 = vadd.f32 %v1572_v3, %v1415_v61  ;;  %v1445_v61 = vadd.f32 %v3230_v53, %v2977_v30  ;;  %v1714_v3 = vld [vmem:[%s3535_s2] sm:$0xff] }
 0x327   :  { %v2261_v23 = vpop.eup %2260  ;;  %v1673_v57 = vadd.f32 %v1641_v7, %v3565_v0  ;;  %2272 = vpow2.f32 %v1540_v51  ;;  %1834 = vadd.xlane.f32.xlu0 %v1774_v2  ;;  %v1448_v7 = vpop.f32.mrf.mxu0  ;;  %v3571_v51 = vld [vmem:[#allocation19_spill] sm:$0xff] }
 0x328   :  { %v2263_v42 = vpop.eup %2262  ;;  %v1642_v36 = vmul.f32 %v2959_v49, %v1604_v33  ;;  %v1573_v22 = vmul.f32 %v2306_v40, %v2261_v23  ;;  %v1715_v40 = vld [vmem:[%s3535_s2 + $0x8] sm:$0xff] }
 0x329   :  { %1705 = vst [vmem:[#allocation8 + $0xb8] sm:$0xff] %v1673_v57  ;;  %v1542_v17 = vmul.f32 1.442695, %v2263_v42  ;;  %v1775_v25 = vmul.f32 %v2263_v42, %v2959_v49  ;;  %v1449_v42 = vadd.f32 %v1448_v7, %v2977_v30 }
 0x32a   :  { %v1674_v39 = vadd.f32 %v1642_v36, %v3566_v4  ;;  %v1605_v1 = vadd.f32 %v1573_v22, %v1419_v46  ;;  %v2312_v36 = vld [vmem:[%s3534_s1 + $0xf8] sm:$0xff]  ;;  %v3572_v22 = vld [vmem:[#allocation20_spill] sm:$0xff] }
 0x32b   :  { %v2265_v6 = vpop.eup %2264  ;;  %2274 = vpow2.f32 %v1542_v17  ;;  %1836 = vadd.xlane.f32.xlu1 %v1775_v25 }
 0x32c   :  { %v2267_v48 = vpop.eup %2266  ;;  %1706 = vst [vmem:[#allocation8 + $0xc0] sm:$0xff] %v1674_v39  ;;  %v1643_v52 = vmul.f32 %v2959_v49, %v1605_v1  ;;  %v1574_v35 = vmul.f32 %v2307_v26, %v2265_v6  ;;  %v1716_v1 = vld [vmem:[%s3535_s2 + $0x10] sm:$0xff]  ;;  %v3573_v6 = vld [vmem:[#allocation21_spill] sm:$0xff]  ;;  %v1717_v26 = vld [vmem:[%s3535_s2 + $0x18] sm:$0xff] }
 0x32d   :  { %v1544_v41 = vmul.f32 1.442695, %v2267_v48  ;;  %v1776_v43 = vmul.f32 %v2267_v48, %v2959_v49 }
 0x32e   :  { %v1675_v18 = vadd.f32 %v1643_v52, %v3567_v31  ;;  %v1606_v14 = vadd.f32 %v1574_v35, %v1425_v9 }
 0x32f   :  { %v2269_v20 = vpop.eup %2268  ;;  %2276 = vpow2.f32 %v1544_v41  ;;  %1838 = vadd.xlane.f32.xlu0 %v1776_v43 }
 0x330   :  { %v2271_v47 = vpop.eup %2270  ;;  %1707 = vst [vmem:[#allocation8 + $0xc8] sm:$0xff] %v1675_v18  ;;  %v1644_v16 = vmul.f32 %v2959_v49, %v1606_v14  ;;  %v1575_v44 = vmul.f32 %v2308_v12, %v2269_v20 }
 0x331   :  { %v1546_v32 = vmul.f32 1.442695, %v2271_v47  ;;  %v1777_v5 = vmul.f32 %v2271_v47, %v2959_v49 }
 0x332   :  { %v1676_v55 = vadd.f32 %v1644_v16, %v3568_v38  ;;  %v1607_v27 = vadd.f32 %v1575_v44, %v1429_v60 }
 0x333   :  { %2278 = vpow2.f32 %v1546_v32  ;;  %1840 = vadd.xlane.f32.xlu1 %v1777_v5 }
 0x334   :  { %v2273_v37 = vpop.eup %2272  ;;  %1708 = vst [vmem:[#allocation8 + $0xd0] sm:$0xff] %v1676_v55  ;;  %v1645_v63 = vmul.f32 %v2959_v49, %v1607_v27 }
 0x335   :  { %v1576_v19 = vmul.f32 %v2309_v15, %v2273_v37 }
 0x336   :  { %v1677_v50 = vadd.f32 %v1645_v63, %v3569_v8 }
 0x337   :  { %v1608_v29 = vadd.f32 %v1576_v19, %v1435_v45 }
 0x338   :  { %v2275_v21 = vpop.eup %2274  ;;  %1709 = vst [vmem:[#allocation8 + $0xd8] sm:$0xff] %v1677_v50 }
 0x339   :  { %v1646_v10 = vmul.f32 %v2959_v49, %v1608_v29  ;;  %v1577_v54 = vmul.f32 %v2310_v56, %v2275_v21 }
 0x33b   :  { %v1678_v24 = vadd.f32 %v1646_v10, %v3570_v59  ;;  %v1609_v28 = vadd.f32 %v1577_v54, %v1439_v58 }
 0x33c   :  { %v2277_v13 = vpop.eup %2276 }
 0x33d   :  { %1710 = vst [vmem:[#allocation8 + $0xe0] sm:$0xff] %v1678_v24  ;;  %v1647_v62 = vmul.f32 %v2959_v49, %v1609_v28  ;;  %v1578_v34 = vmul.f32 %v2311_v11, %v2277_v13 }
 0x33f   :  { %v1679_v2 = vadd.f32 %v1647_v62, %v3571_v51  ;;  %v1610_v33 = vadd.f32 %v1578_v34, %v1445_v61  ;;  %v1779_v23 = vpop.xlane.xlu0 %1778 }
 0x340   :  { %v2279_v0 = vpop.eup %2278  ;;  %v1842_v57 = vadd.f32 %v1779_v23, %v1714_v3 }
 0x341   :  { %1711 = vst [vmem:[#allocation8 + $0xe8] sm:$0xff] %v1679_v2  ;;  %v1648_v53 = vmul.f32 %v2959_v49, %v1610_v33  ;;  %v1579_v46 = vmul.f32 %v2312_v36, %v2279_v0 }
 0x342   :  { %1875 = vst.msk [vmem:[%s3543_s10] sm:$0xff] %vm1874_vm0, %v1842_v57 }
 0x343   :  { %v1680_v17 = vadd.f32 %v1648_v53, %v3572_v22  ;;  %v1611_v25 = vadd.f32 %v1579_v46, %v1449_v42  ;;  %v1781_v4 = vpop.xlane.xlu0 %1780 }
 0x344   :  { %v1843_v39 = vadd.f32 %v1781_v4, %v1715_v40 }
 0x345   :  { %1712 = vst [vmem:[#allocation8 + $0xf0] sm:$0xff] %v1680_v17  ;;  %v1649_v30 = vmul.f32 %v2959_v49, %v1611_v25 }
 0x346   :  { %1876 = vst.msk [vmem:[%s3543_s10 + $0x8] sm:$0xff] %vm1874_vm0, %v1843_v39 }
 0x347   :  { %v1681_v48 = vadd.f32 %v1649_v30, %v3573_v6  ;;  %v1783_v52 = vpop.xlane.xlu1 %1782 }
 0x348   :  { %v1844_v9 = vadd.f32 %v1783_v52, %v1716_v1 }
 0x349   :  { %1713 = vst [vmem:[#allocation8 + $0xf8] sm:$0xff] %v1681_v48 }
 0x34a   :  { %1877 = vst.msk [vmem:[%s3543_s10 + $0x10] sm:$0xff] %vm1874_vm0, %v1844_v9 }
 0x34b   :  { %2385 = shalt.err (!%p2382_p5)
}
 0x34c   :  { %1918 = dma.vmem_to_hbm [thread:$0]  %s1913_s6, 4096, %s3542_s9, [#allocation4], %s2402_s18, %s2402_s18, %s2403_s19   ;;  %v1785_v49 = vpop.xlane.xlu1 %1784 }
 0x34d   :  { %v1845_v35 = vadd.f32 %v1785_v49, %v1717_v26  ;;  %v1718_v41 = vld [vmem:[%s3535_s2 + $0x20] sm:$0xff]  ;;  %v1719_v18 = vld [vmem:[%s3535_s2 + $0x28] sm:$0xff]  ;;  %v1720_v47 = vld [vmem:[%s3535_s2 + $0x30] sm:$0xff] }
 0x34e   :  { %v1721_v12 = vld [vmem:[%s3535_s2 + $0x38] sm:$0xff]  ;;  %v1722_v5 = vld [vmem:[%s3535_s2 + $0x40] sm:$0xff]  ;;  %v1723_v27 = vld [vmem:[%s3535_s2 + $0x48] sm:$0xff] }
 0x34f   :  { %1878 = vst.msk [vmem:[%s3543_s10 + $0x18] sm:$0xff] %vm1874_vm0, %v1845_v35  ;;  %v1724_v45 = vld [vmem:[%s3535_s2 + $0x50] sm:$0xff]  ;;  %v1725_v8 = vld [vmem:[%s3535_s2 + $0x58] sm:$0xff]  ;;  %v1726_v21 = vld [vmem:[%s3535_s2 + $0x60] sm:$0xff] }
 0x350   :  { %v1787_v43 = vpop.xlane.xlu0 %1786  ;;  %v1727_v56 = vld [vmem:[%s3535_s2 + $0x68] sm:$0xff]  ;;  %v1728_v24 = vld [vmem:[%s3535_s2 + $0x70] sm:$0xff]  ;;  %v1729_v62 = vld [vmem:[%s3535_s2 + $0x78] sm:$0xff] }
 0x351   :  { %v1846_v31 = vadd.f32 %v1787_v43, %v1718_v41  ;;  %v1730_v34 = vld [vmem:[%s3535_s2 + $0x80] sm:$0xff]  ;;  %v1731_v51 = vld [vmem:[%s3535_s2 + $0x88] sm:$0xff]  ;;  %v1732_v23 = vld [vmem:[%s3535_s2 + $0x90] sm:$0xff] }
 0x352   :  { %v1733_v53 = vld [vmem:[%s3535_s2 + $0x98] sm:$0xff]  ;;  %v1734_v46 = vld [vmem:[%s3535_s2 + $0xa0] sm:$0xff]  ;;  %v1735_v17 = vld [vmem:[%s3535_s2 + $0xa8] sm:$0xff] }
 0x353   :  { %1879 = vst.msk [vmem:[%s3543_s10 + $0x20] sm:$0xff] %vm1874_vm0, %v1846_v31  ;;  %v1736_v39 = vld [vmem:[%s3535_s2 + $0xb0] sm:$0xff]  ;;  %v1737_v6 = vld [vmem:[%s3535_s2 + $0xb8] sm:$0xff]  ;;  %v1738_v9 = vld [vmem:[%s3535_s2 + $0xc0] sm:$0xff] }
 0x354   :  { %v1789_v14 = vpop.xlane.xlu1 %1788  ;;  %v1739_v35 = vld [vmem:[%s3535_s2 + $0xc8] sm:$0xff]  ;;  %v1740_v31 = vld [vmem:[%s3535_s2 + $0xd0] sm:$0xff] }
 0x355   :  { %v1847_v20 = vadd.f32 %v1789_v14, %v1719_v18 }
 0x357   :  { %1880 = vst.msk [vmem:[%s3543_s10 + $0x28] sm:$0xff] %vm1874_vm0, %v1847_v20  ;;  %v1741_v20 = vld [vmem:[%s3535_s2 + $0xd8] sm:$0xff] }
 0x358   :  { %v1791_v16 = vpop.xlane.xlu0 %1790 }
 0x359   :  { %v1848_v60 = vadd.f32 %v1791_v16, %v1720_v47 }
 0x35b   :  { %1881 = vst.msk [vmem:[%s3543_s10 + $0x30] sm:$0xff] %vm1874_vm0, %v1848_v60  ;;  %v1742_v60 = vld [vmem:[%s3535_s2 + $0xe0] sm:$0xff] }
 0x35c   :  { %v1793_v44 = vpop.xlane.xlu1 %1792 }
 0x35d   :  { %v1849_v32 = vadd.f32 %v1793_v44, %v1721_v12 }
 0x35f   :  { %1882 = vst.msk [vmem:[%s3543_s10 + $0x38] sm:$0xff] %vm1874_vm0, %v1849_v32  ;;  %v1795_v38 = vpop.xlane.xlu0 %1794  ;;  %v1743_v32 = vld [vmem:[%s3535_s2 + $0xe8] sm:$0xff] }
 0x360   :  { %v1850_v55 = vadd.f32 %v1795_v38, %v1722_v5 }
 0x362   :  { %1883 = vst.msk [vmem:[%s3543_s10 + $0x40] sm:$0xff] %vm1874_vm0, %v1850_v55  ;;  %v1744_v55 = vld [vmem:[%s3535_s2 + $0xf0] sm:$0xff] }
 0x363   :  { %v1797_v37 = vpop.xlane.xlu1 %1796 }
 0x364   :  { %v1851_v63 = vadd.f32 %v1797_v37, %v1723_v27 }
 0x366   :  { %1884 = vst.msk [vmem:[%s3543_s10 + $0x48] sm:$0xff] %vm1874_vm0, %v1851_v63  ;;  %v1745_v63 = vld [vmem:[%s3535_s2 + $0xf8] sm:$0xff] }
 0x367   :  { %v1799_v15 = vpop.xlane.xlu0 %1798 }
 0x368   :  { %v1852_v19 = vadd.f32 %v1799_v15, %v1724_v45 }
 0x36a   :  { %1885 = vst.msk [vmem:[%s3543_s10 + $0x50] sm:$0xff] %vm1874_vm0, %v1852_v19 }
 0x36b   :  { %v1801_v50 = vpop.xlane.xlu1 %1800 }
 0x36c   :  { %v1853_v29 = vadd.f32 %v1801_v50, %v1725_v8 }
 0x36e   :  { %1886 = vst.msk [vmem:[%s3543_s10 + $0x58] sm:$0xff] %vm1874_vm0, %v1853_v29 }
 0x370   :  { %v1803_v10 = vpop.xlane.xlu0 %1802 }
 0x371   :  { %v1854_v58 = vadd.f32 %v1803_v10, %v1726_v21 }
 0x373   :  { %1887 = vst.msk [vmem:[%s3543_s10 + $0x60] sm:$0xff] %vm1874_vm0, %v1854_v58 }
 0x374   :  { %v1805_v54 = vpop.xlane.xlu1 %1804 }
 0x375   :  { %v1855_v59 = vadd.f32 %v1805_v54, %v1727_v56 }
 0x377   :  { %1888 = vst.msk [vmem:[%s3543_s10 + $0x68] sm:$0xff] %vm1874_vm0, %v1855_v59 }
 0x378   :  { %v1807_v28 = vpop.xlane.xlu0 %1806 }
 0x379   :  { %v1856_v13 = vadd.f32 %v1807_v28, %v1728_v24 }
 0x37b   :  { %1889 = vst.msk [vmem:[%s3543_s10 + $0x70] sm:$0xff] %vm1874_vm0, %v1856_v13 }
 0x37c   :  { %v1809_v61 = vpop.xlane.xlu1 %1808 }
 0x37d   :  { %v1857_v11 = vadd.f32 %v1809_v61, %v1729_v62 }
 0x37f   :  { %1890 = vst.msk [vmem:[%s3543_s10 + $0x78] sm:$0xff] %vm1874_vm0, %v1857_v11  ;;  %v1811_v3 = vpop.xlane.xlu0 %1810 }
 0x380   :  { %v1858_v7 = vadd.f32 %v1811_v3, %v1730_v34 }
 0x382   :  { %1891 = vst.msk [vmem:[%s3543_s10 + $0x80] sm:$0xff] %vm1874_vm0, %v1858_v7 }
 0x383   :  { %v1813_v2 = vpop.xlane.xlu1 %1812 }
 0x384   :  { %v1859_v33 = vadd.f32 %v1813_v2, %v1731_v51 }
 0x386   :  { %1892 = vst.msk [vmem:[%s3543_s10 + $0x88] sm:$0xff] %vm1874_vm0, %v1859_v33 }
 0x387   :  { %v1815_v0 = vpop.xlane.xlu0 %1814 }
 0x388   :  { %v1860_v57 = vadd.f32 %v1815_v0, %v1732_v23 }
 0x38a   :  { %1893 = vst.msk [vmem:[%s3543_s10 + $0x90] sm:$0xff] %vm1874_vm0, %v1860_v57 }
 0x38b   :  { %v1817_v42 = vpop.xlane.xlu1 %1816 }
 0x38c   :  { %v1861_v36 = vadd.f32 %v1817_v42, %v1733_v53 }
 0x38e   :  { %1894 = vst.msk [vmem:[%s3543_s10 + $0x98] sm:$0xff] %vm1874_vm0, %v1861_v36 }
 0x390   :  { %v1819_v40 = vpop.xlane.xlu0 %1818 }
 0x391   :  { %v1862_v22 = vadd.f32 %v1819_v40, %v1734_v46 }
 0x393   :  { %1895 = vst.msk [vmem:[%s3543_s10 + $0xa0] sm:$0xff] %vm1874_vm0, %v1862_v22 }
 0x394   :  { %v1821_v25 = vpop.xlane.xlu1 %1820 }
 0x395   :  { %v1863_v4 = vadd.f32 %v1821_v25, %v1735_v17 }
 0x397   :  { %1896 = vst.msk [vmem:[%s3543_s10 + $0xa8] sm:$0xff] %vm1874_vm0, %v1863_v4 }
 0x398   :  { %v1823_v30 = vpop.xlane.xlu0 %1822 }
 0x399   :  { %v1864_v1 = vadd.f32 %v1823_v30, %v1736_v39 }
 0x39b   :  { %1897 = vst.msk [vmem:[%s3543_s10 + $0xb0] sm:$0xff] %vm1874_vm0, %v1864_v1 }
 0x39c   :  { %v1825_v48 = vpop.xlane.xlu1 %1824 }
 0x39d   :  { %v1865_v52 = vadd.f32 %v1825_v48, %v1737_v6 }
 0x39f   :  { %1898 = vst.msk [vmem:[%s3543_s10 + $0xb8] sm:$0xff] %vm1874_vm0, %v1865_v52  ;;  %v1827_v26 = vpop.xlane.xlu0 %1826 }
 0x3a0   :  { %v1866_v49 = vadd.f32 %v1827_v26, %v1738_v9 }
 0x3a2   :  { %1899 = vst.msk [vmem:[%s3543_s10 + $0xc0] sm:$0xff] %vm1874_vm0, %v1866_v49 }
 0x3a3   :  { %v1829_v41 = vpop.xlane.xlu1 %1828 }
 0x3a4   :  { %v1867_v43 = vadd.f32 %v1829_v41, %v1739_v35 }
 0x3a6   :  { %1900 = vst.msk [vmem:[%s3543_s10 + $0xc8] sm:$0xff] %vm1874_vm0, %v1867_v43 }
 0x3a7   :  { %v1831_v18 = vpop.xlane.xlu0 %1830 }
 0x3a8   :  { %v1868_v14 = vadd.f32 %v1831_v18, %v1740_v31 }
 0x3aa   :  { %1901 = vst.msk [vmem:[%s3543_s10 + $0xd0] sm:$0xff] %vm1874_vm0, %v1868_v14 }
 0x3ab   :  { %v1833_v47 = vpop.xlane.xlu1 %1832 }
 0x3ac   :  { %v1869_v16 = vadd.f32 %v1833_v47, %v1741_v20 }
 0x3ae   :  { %1902 = vst.msk [vmem:[%s3543_s10 + $0xd8] sm:$0xff] %vm1874_vm0, %v1869_v16 }
 0x3b0   :  { %v1835_v12 = vpop.xlane.xlu0 %1834 }
 0x3b1   :  { %v1870_v44 = vadd.f32 %v1835_v12, %v1742_v60 }
 0x3b3   :  { %1903 = vst.msk [vmem:[%s3543_s10 + $0xe0] sm:$0xff] %vm1874_vm0, %v1870_v44 }
 0x3b4   :  { %v1837_v5 = vpop.xlane.xlu1 %1836 }
 0x3b5   :  { %v1871_v38 = vadd.f32 %v1837_v5, %v1743_v32 }
 0x3b7   :  { %1904 = vst.msk [vmem:[%s3543_s10 + $0xe8] sm:$0xff] %vm1874_vm0, %v1871_v38 }
 0x3b8   :  { %v1839_v27 = vpop.xlane.xlu0 %1838 }
 0x3b9   :  { %v1872_v37 = vadd.f32 %v1839_v27, %v1744_v55 }
 0x3bb   :  { %1905 = vst.msk [vmem:[%s3543_s10 + $0xf0] sm:$0xff] %vm1874_vm0, %v1872_v37 }
 0x3bc   :  { %v1841_v45 = vpop.xlane.xlu1 %1840 }
 0x3bd   :  { %v1873_v15 = vadd.f32 %v1841_v45, %v1745_v63 }
 0x3bf   :  { %1906 = vst.msk [vmem:[%s3543_s10 + $0xf8] sm:$0xff] %vm1874_vm0, %v1873_v15 }
 0x3c0   :  { %2398 = dma.done.wait [#allocation4], 4096  }
 0x3c1   :  { %2399 = vsyncadd [#allocation4], 4294963200 }
 0x3c2   :  { %1926 = vsyncpa [#allocation3], 1 }
 0x3c3   :  { %1927 = vsyncpa [#allocation6], 1 }
 0x3c4   :  { %1928 = vsyncpa [#allocation4], 1 }

</bundles_post_ra>
